<compile_context>
chip_gen: v6e
topology: v6e:2x2x1
jax: 0.10.0
libtpu: 0.0.40
codegen_flags: <defaults>
</compile_context>

<pallas_src>
import math

import jax
import jax.numpy as jnp
from jax.experimental import pallas as pl
from jax.experimental.pallas import tpu as pltpu

# ---- model / problem sizes (small, consistent with the module's forward) ----
B, S = 2, 16          # batch, sequence length
BT = B * S            # flattened token count
F_IN = 8              # vocab_size (input feature dim; embedding=False -> Linear proj)
D = 32                # d_model
N_LAYERS = 2          # N
HEADS = 2
DH = D // HEADS
GS = B * HEADS * S    # stacked (batch, head, seq) rows for batched attention
K = 3                 # ff_conv_kernel_size
D_FF = 64
OUT = 8               # out_size
EPS = 1e-5

# packed "vectors" slab: one vector per row, data starting at lane 0, 128 lanes wide
VROWS = 8             # rows per layer
R_LN1G, R_LN1B, R_LN2G, R_LN2B, R_BQKV, R_BO, R_C1B, R_C2B = range(VROWS)
R_LNFG = N_LAYERS * VROWS
R_LNFB = R_LNFG + 1
R_BOUT = R_LNFG + 2
VEC_ROWS = R_BOUT + 1


# ---------------- layer norm ----------------
def _layer_norm_ref(x, g, b):
    # two-pass form, used only by the pure-JAX reference (the spec)
    mu = jnp.mean(x, axis=-1, keepdims=True)
    var = jnp.mean((x - mu) ** 2, axis=-1, keepdims=True)
    return (x - mu) * jax.lax.rsqrt(var + EPS) * g + b


def _layer_norm_fast(x, g, b):
    # one-pass stats: the two cross-lane reductions issue independently (shorter XLU chain)
    n = x.shape[-1]
    s1 = jnp.sum(x, axis=-1, keepdims=True)
    s2 = jnp.sum(x * x, axis=-1, keepdims=True)
    mu = s1 * (1.0 / n)
    var = s2 * (1.0 / n) - mu * mu
    return (x - mu) * jax.lax.rsqrt(var + EPS) * g + b


# ---------------- Pallas kernel ----------------
def _conv1d_im2col(x, w_flat, bias, m_prev, m_next):
    """'same' zero-padded conv over time on flattened (BT, Cin) tokens, K == 3.

    Shifted copies come from XLU sublane rotates (pltpu.roll) multiplied by precomputed
    per-row edge masks (which also zero cross-sequence rows), lane-concatenated into
    im2col columns, then a single MXU matmul against the (K*Cin, Cout) weight slab.
    """
    bt = x.shape[0]
    x_prev = pltpu.roll(x, 1, 0) * m_prev          # row r <- x[r-1]; zeroed at sequence starts
    x_next = pltpu.roll(x, bt - 1, 0) * m_next     # row r <- x[r+1]; zeroed at sequence ends
    xcat = jnp.concatenate([x_prev, x, x_next], axis=-1)        # (BT, K*Cin)
    return jnp.dot(xcat, w_flat, preferred_element_type=jnp.float32) + bias


def _kernel(x_ref, amask_ref, tokb_ref, win_ref, qkvo_ref, c1w_ref, c2w_ref,
            vec_ref, wout_ref, out_ref):
    # ---- input projection (sqrt(d_model) scale + positional encoding folded host-side) ----
    h = jnp.dot(x_ref[...], win_ref[...], preferred_element_type=jnp.float32) + tokb_ref[...]

    # ---- hoisted, call-invariant conv edge masks (computed once per forward) ----
    seq_pos = jax.lax.broadcasted_iota(jnp.int32, (BT, 1), 0) % S
    m_prev = (seq_pos > 0).astype(jnp.float32)          # token r-1 is in the same sequence
    m_next = (seq_pos < S - 1).astype(jnp.float32)      # token r+1 is in the same sequence

    for l in range(N_LAYERS):
        vb = l * VROWS

        # ---- masked multi-head self-attention (pre-LN), batched over (batch, head) ----
        xn = _layer_norm_fast(h,
                              vec_ref[vb + R_LN1G:vb + R_LN1G + 1, :D],
                              vec_ref[vb + R_LN1B:vb + R_LN1B + 1, :D])
        qkvo = qkvo_ref[l * D:(l + 1) * D, :]            # (D, 128) = [Wq'|Wk|Wv|Wo] lane-packed
        qkv = jnp.dot(xn, qkvo[:, :3 * D], preferred_element_type=jnp.float32)
        qkv = qkv + vec_ref[vb + R_BQKV:vb + R_BQKV + 1, :3 * D]

        # stack heads along rows: (GS, DH), row order (b, head, s)
        qs, ks, vs = [], [], []
        for b in range(B):
            for hd in range(HEADS):
                r0, c0 = b * S, hd * DH
                qs.append(qkv[r0:r0 + S, c0:c0 + DH])              # Q already * 1/sqrt(DH)
                ks.append(qkv[r0:r0 + S, D + c0:D + c0 + DH])
                vs.append(qkv[r0:r0 + S, 2 * D + c0:2 * D + c0 + DH])
        q_st = jnp.concatenate(qs, axis=0)
        k_st = jnp.concatenate(ks, axis=0)
        v_st = jnp.concatenate(vs, axis=0)

        # one (GS,DH)x(DH,GS) score matmul; additive mask: 0 on own (b,head) block with
        # valid keys, -1e9 elsewhere -> exp underflows to exactly 0 off-block
        sc = jnp.dot(q_st, k_st.T, preferred_element_type=jnp.float32) + amask_ref[...]
        sc = sc - jnp.max(sc, axis=-1, keepdims=True)
        pr = jnp.exp(sc)
        pr = pr * pl.reciprocal(jnp.sum(pr, axis=-1, keepdims=True), approx=True)
        ctx_st = jnp.dot(pr, v_st, preferred_element_type=jnp.float32)   # (GS, DH)

        # head concat (cheap lane concat) then ONE full-Wo matmul
        ctx = jnp.concatenate(
            [jnp.concatenate(
                [ctx_st[(b * HEADS + hd) * S:(b * HEADS + hd + 1) * S, :]
                 for hd in range(HEADS)], axis=-1)
             for b in range(B)], axis=0)                                  # (BT, D)
        attn = jnp.dot(ctx, qkvo[:, 3 * D:], preferred_element_type=jnp.float32)
        h = h + attn + vec_ref[vb + R_BO:vb + R_BO + 1, :D]

        # ---- conv feed-forward (pre-LN): roll+mask im2col, one matmul per conv ----
        xn = _layer_norm_fast(h,
                              vec_ref[vb + R_LN2G:vb + R_LN2G + 1, :D],
                              vec_ref[vb + R_LN2B:vb + R_LN2B + 1, :D])
        y = _conv1d_im2col(xn, c1w_ref[l * K * D:(l + 1) * K * D, :],
                           vec_ref[vb + R_C1B:vb + R_C1B + 1, :D_FF], m_prev, m_next)
        y = jnp.maximum(y, 0.0)
        y = _conv1d_im2col(y, c2w_ref[l * K * D_FF:(l + 1) * K * D_FF, :],
                           vec_ref[vb + R_C2B:vb + R_C2B + 1, :D], m_prev, m_next)
        h = h + y

    h = _layer_norm_fast(h, vec_ref[R_LNFG:R_LNFG + 1, :D], vec_ref[R_LNFB:R_LNFB + 1, :D])
    out = jnp.dot(h, wout_ref[...], preferred_element_type=jnp.float32)
    out = out + vec_ref[R_BOUT:R_BOUT + 1, :OUT]
    out_ref[...] = out.astype(out_ref.dtype)


# ---------------- host-side parameter packing (one-time) ----------------
def prepare_kernel_params(params):
    """Fuse QKV(+Wo) into one lane-packed slab per layer, flatten conv taps for im2col,
    pack every small vector into one (VEC_ROWS, 128) slab, fold scales / PE."""
    scale = jnp.float32(math.sqrt(D))
    inv_sqrt_dh = jnp.float32(1.0 / math.sqrt(DH))

    wq = params["wq"] * inv_sqrt_dh                  # fold 1/sqrt(d_head) into Q projection
    bq = params["bq"] * inv_sqrt_dh
    qkvo = jnp.concatenate([wq, params["wk"], params["wv"], params["wo"]], axis=-1)
    qkvo = qkvo.reshape(N_LAYERS * D, 4 * D)         # (64, 128): exact lane fit, 1 DMA
    bqkv = jnp.concatenate([bq, params["bk"], params["bv"]], axis=-1)    # (N, 1, 3D)

    def row(v):
        v = jnp.asarray(v, jnp.float32).reshape(1, -1)
        return jnp.pad(v, ((0, 0), (0, 128 - v.shape[1])))

    rows = []
    for l in range(N_LAYERS):
        rows += [row(params["ln1g"][l]), row(params["ln1b"][l]),
                 row(params["ln2g"][l]), row(params["ln2b"][l]),
                 row(bqkv[l]), row(params["bo"][l]),
                 row(params["c1b"][l]), row(params["c2b"][l])]
    rows += [row(params["lnfg"]), row(params["lnfb"]), row(params["bout"])]
    vecs = jnp.concatenate(rows, axis=0)             # (VEC_ROWS, 128)

    # NOTE: tok_bias bakes the batch tiling (B) in; re-run prepare if B changes.
    tok_bias = jnp.tile(params["bin"] * scale + params["pe"], (B, 1))    # (BT, D)

    return {
        "win": params["win"] * scale,                                   # (F_IN, D)
        "tok_bias": tok_bias,                                           # (BT, D)
        "qkvo": qkvo,                                                   # (N*D, 4D)
        "c1w": params["c1w"].reshape(N_LAYERS * K * D, D_FF),           # (N*K*D, D_FF)
        "c2w": params["c2w"].reshape(N_LAYERS * K * D_FF, D),           # (N*K*D_FF, D)
        "vecs": vecs,                                                   # (VEC_ROWS, 128)
        "wout": params["wout"],                                         # (D, OUT)
    }


def build_attn_mask(src_mask):
    """Additive (GS, GS) attention mask: 0 within a (batch, head) diagonal block whose key
    is valid, -1e9 everywhere else (off-block and padded keys)."""
    m = src_mask.reshape(B, S) > 0.0
    grp = jnp.repeat(jnp.arange(B * HEADS, dtype=jnp.int32), S)          # (GS,)
    same = grp[:, None] == grp[None, :]                                  # block-diagonal
    keym = jnp.repeat(m, HEADS, axis=0).reshape(-1)                      # key validity, (b,hd,s)
    keep = same & keym[None, :]
    return jnp.where(keep, 0.0, -1e9).astype(jnp.float32)


def post_low_energy_forward(src, src_mask, kp):
    x = src.reshape(BT, F_IN)
    amask = build_attn_mask(src_mask)
    vmem = pl.BlockSpec(memory_space=pltpu.MemorySpace.VMEM)
    out = pl.pallas_call(
        _kernel,
        out_shape=jax.ShapeDtypeStruct((BT, OUT), jnp.float32),
        in_specs=[vmem] * 9,
        out_specs=vmem,
    )(x, amask, kp["tok_bias"], kp["win"], kp["qkvo"], kp["c1w"], kp["c2w"],
      kp["vecs"], kp["wout"])
    return out.reshape(B, S, OUT)


# ---------------- pure-JAX reference (original, unfused parameterization) ----------------
def _conv1d_same(x, w, b):
    # x: (S, Cin), w: (K, Cin, Cout), b: (1, Cout). Cross-correlation, zero 'same' pad.
    s, cin = x.shape
    cout = w.shape[-1]
    acc = jnp.zeros((s, cout), jnp.float32)
    pad = K // 2
    for t in range(K):
        off = t - pad
        if off == 0:
            xs = x
        elif off > 0:
            xs = jnp.concatenate([x[off:], jnp.zeros((off, cin), x.dtype)], axis=0)
        else:
            xs = jnp.concatenate([jnp.zeros((-off, cin), x.dtype), x[: s + off]], axis=0)
        acc = acc + jnp.dot(xs, w[t], preferred_element_type=jnp.float32)
    return acc + b


def _encode_one(x, mask_row, p):
    """One sequence: x (S, F_IN), mask_row (1, S) float, p dict of arrays -> (S, OUT)."""
    h = jnp.dot(x, p["win"], preferred_element_type=jnp.float32) + p["bin"]
    h = h * jnp.float32(math.sqrt(D)) + p["pe"]
    keep = mask_row > 0.0
    neg = jnp.float32(-1e9)
    for l in range(N_LAYERS):
        xn = _layer_norm_ref(h, p["ln1g"][l], p["ln1b"][l])
        q = jnp.dot(xn, p["wq"][l], preferred_element_type=jnp.float32) + p["bq"][l]
        k = jnp.dot(xn, p["wk"][l], preferred_element_type=jnp.float32) + p["bk"][l]
        v = jnp.dot(xn, p["wv"][l], preferred_element_type=jnp.float32) + p["bv"][l]
        ctxs = []
        for hd in range(HEADS):
            lo, hi = hd * DH, (hd + 1) * DH
            qh, kh, vh = q[:, lo:hi], k[:, lo:hi], v[:, lo:hi]
            sc = jnp.dot(qh, kh.T, preferred_element_type=jnp.float32)
            sc = sc / jnp.float32(math.sqrt(DH))
            sc = jnp.where(keep, sc, neg)
            sc = sc - jnp.max(sc, axis=-1, keepdims=True)
            pr = jnp.exp(sc)
            pr = pr / jnp.sum(pr, axis=-1, keepdims=True)
            ctxs.append(jnp.dot(pr, vh, preferred_element_type=jnp.float32))
        ctx = jnp.concatenate(ctxs, axis=-1)
        h = h + jnp.dot(ctx, p["wo"][l], preferred_element_type=jnp.float32) + p["bo"][l]
        xn = _layer_norm_ref(h, p["ln2g"][l], p["ln2b"][l])
        y = _conv1d_same(xn, p["c1w"][l], p["c1b"][l])
        y = jnp.maximum(y, 0.0)
        y = _conv1d_same(y, p["c2w"][l], p["c2b"][l])
        h = h + y
    h = _layer_norm_ref(h, p["lnfg"], p["lnfb"])
    return jnp.dot(h, p["wout"], preferred_element_type=jnp.float32) + p["bout"]


def reference(src, src_mask, params):
    outs = [_encode_one(src[b], src_mask[b], params) for b in range(B)]
    return jnp.stack(outs, axis=0)


# ---------------- parameter init (deterministic, synthetic) ----------------
def _sinusoid_pe():
    pos = jnp.arange(S, dtype=jnp.float32)[:, None]
    i = jnp.arange(D // 2, dtype=jnp.float32)[None, :]
    ang = pos / jnp.power(10000.0, 2.0 * i / D)
    pe = jnp.zeros((S, D), jnp.float32)
    pe = pe.at[:, 0::2].set(jnp.sin(ang))
    pe = pe.at[:, 1::2].set(jnp.cos(ang))
    return pe


def init_params(key):
    ks = jax.random.split(key, 12)

    def w(k, shape, scale=0.1):
        return (scale * jax.random.normal(k, shape)).astype(jnp.float32)

    z = lambda shape: jnp.zeros(shape, jnp.float32)
    o = lambda shape: jnp.ones(shape, jnp.float32)
    return {
        "win": w(ks[0], (F_IN, D)),
        "bin": z((1, D)),
        "pe": _sinusoid_pe(),
        "wq": w(ks[1], (N_LAYERS, D, D)),
        "bq": z((N_LAYERS, 1, D)),
        "wk": w(ks[2], (N_LAYERS, D, D)),
        "bk": z((N_LAYERS, 1, D)),
        "wv": w(ks[3], (N_LAYERS, D, D)),
        "bv": z((N_LAYERS, 1, D)),
        "wo": w(ks[4], (N_LAYERS, D, D)),
        "bo": z((N_LAYERS, 1, D)),
        "ln1g": o((N_LAYERS, 1, D)),
        "ln1b": z((N_LAYERS, 1, D)),
        "ln2g": o((N_LAYERS, 1, D)),
        "ln2b": z((N_LAYERS, 1, D)),
        "c1w": w(ks[5], (N_LAYERS, K, D, D_FF)),
        "c1b": z((N_LAYERS, 1, D_FF)),
        "c2w": w(ks[6], (N_LAYERS, K, D_FF, D)),
        "c2b": z((N_LAYERS, 1, D)),
        "lnfg": o((1, D)),
        "lnfb": z((1, D)),
        "wout": w(ks[7], (D, OUT)),
        "bout": z((1, OUT)),
    }


if __name__ == "__main__":
    root = jax.random.PRNGKey(0)
    kp_key, kx = jax.random.split(root)
    params = init_params(kp_key)
    kernel_params = prepare_kernel_params(params)   # one-time weight transform / packing

    src = jax.random.normal(kx, (B, S, F_IN), jnp.float32)
    # mask: 1.0 = valid frame; pad the last 3 frames of the second sequence
    src_mask = jnp.ones((B, 1, S), jnp.float32).at[1, 0, S - 3:].set(0.0)

    out = post_low_energy_forward(src, src_mask, kernel_params)
    out = jax.block_until_ready(out)

    ref = reference(src, src_mask, params)
    assert out.shape == (B, S, OUT)
    assert bool(jnp.all(jnp.isfinite(out)))
    assert bool(jnp.allclose(out, ref, atol=1e-2, rtol=1e-2)), float(
        jnp.max(jnp.abs(out - ref))
    )
    print("KERNEL_OK")
</pallas_src>

<mosaic_0001>
module attributes {stable_mosaic.version = 11 : i64} {
  func.func @_kernel(%arg0: memref<32x8xf32, #tpu.memory_space<vmem>>, %arg1: memref<64x64xf32, #tpu.memory_space<vmem>>, %arg2: memref<32x32xf32, #tpu.memory_space<vmem>>, %arg3: memref<8x32xf32, #tpu.memory_space<vmem>>, %arg4: memref<64x128xf32, #tpu.memory_space<vmem>>, %arg5: memref<192x64xf32, #tpu.memory_space<vmem>>, %arg6: memref<384x32xf32, #tpu.memory_space<vmem>>, %arg7: memref<19x128xf32, #tpu.memory_space<vmem>>, %arg8: memref<32x8xf32, #tpu.memory_space<vmem>>, %arg9: memref<32x8xf32, #tpu.memory_space<vmem>>) attributes {dimension_semantics = [], scalar_prefetch = 0 : i64, scratch_operands = 0 : i64, tpu.core_type = #tpu.core_type<tc>} {
    %c0 = arith.constant 0 : index
    %c0_0 = arith.constant 0 : index
    %0 = vector.load %arg0[%c0, %c0_0] : memref<32x8xf32, #tpu.memory_space<vmem>>, vector<32x8xf32>
    %c0_1 = arith.constant 0 : index
    %c0_2 = arith.constant 0 : index
    %1 = vector.load %arg3[%c0_1, %c0_2] : memref<8x32xf32, #tpu.memory_space<vmem>>, vector<8x32xf32>
    %cst = arith.constant dense<0.000000e+00> : vector<32x32xf32>
    %2 = tpu.matmul %0, %1, %cst {dimension_numbers = #tpu.dot_dimension_numbers<[1], [0], [0], [1], [0, 0, 1, 1], [], []>} : vector<32x8xf32>, vector<8x32xf32>, vector<32x32xf32> -> vector<32x32xf32>
    %c0_3 = arith.constant 0 : index
    %c0_4 = arith.constant 0 : index
    %3 = vector.load %arg2[%c0_3, %c0_4] : memref<32x32xf32, #tpu.memory_space<vmem>>, vector<32x32xf32>
    %4 = arith.addf %2, %3 : vector<32x32xf32>
    %5 = tpu.iota {dimensions = array<i32: 0>} : vector<32x1xi32>
    %c16_i32 = arith.constant 16 : i32
    %c0_i32 = arith.constant 0 : i32
    %6 = arith.cmpi eq, %c16_i32, %c0_i32 : i32
    %c1_i32 = arith.constant 1 : i32
    %7 = arith.select %6, %c1_i32, %c16_i32 : i32
    %8 = vector.broadcast %7 : i32 to vector<32x1xi32>
    %9 = arith.remsi %5, %8 : vector<32x1xi32>
    %c0_i32_5 = arith.constant 0 : i32
    %10 = vector.broadcast %c0_i32_5 : i32 to vector<32x1xi32>
    %11 = arith.cmpi ne, %9, %10 : vector<32x1xi32>
    %c0_i32_6 = arith.constant 0 : i32
    %12 = vector.broadcast %c0_i32_6 : i32 to vector<32x1xi32>
    %13 = arith.cmpi slt, %9, %12 : vector<32x1xi32>
    %c0_i32_7 = arith.constant 0 : i32
    %14 = arith.cmpi slt, %7, %c0_i32_7 : i32
    %15 = vector.broadcast %14 : i1 to vector<32x1xi1>
    %16 = vector.broadcast %15 : vector<32x1xi1> to vector<32x1xi1>
    %17 = arith.xori %13, %16 : vector<32x1xi1>
    %18 = arith.andi %17, %11 : vector<32x1xi1>
    %19 = vector.broadcast %7 : i32 to vector<32x1xi32>
    %20 = arith.addi %9, %19 : vector<32x1xi32>
    %21 = arith.select %18, %20, %9 : vector<32x1xi1>, vector<32x1xi32>
    %c0_i32_8 = arith.constant 0 : i32
    %22 = vector.broadcast %c0_i32_8 : i32 to vector<32x1xi32>
    %23 = arith.cmpi sgt, %21, %22 : vector<32x1xi32>
    %24 = arith.extui %23 : vector<32x1xi1> to vector<32x1xi32>
    %25 = arith.sitofp %24 : vector<32x1xi32> to vector<32x1xf32>
    %c15_i32 = arith.constant 15 : i32
    %26 = vector.broadcast %c15_i32 : i32 to vector<32x1xi32>
    %27 = arith.cmpi slt, %21, %26 : vector<32x1xi32>
    %28 = arith.extui %27 : vector<32x1xi1> to vector<32x1xi32>
    %29 = arith.sitofp %28 : vector<32x1xi32> to vector<32x1xf32>
    %c0_9 = arith.constant 0 : index
    %c0_10 = arith.constant 0 : index
    %30 = vector.load %arg7[%c0_9, %c0_10] : memref<19x128xf32, #tpu.memory_space<vmem>>, vector<1x32xf32>
    %c1 = arith.constant 1 : index
    %c0_11 = arith.constant 0 : index
    %31 = vector.load %arg7[%c1, %c0_11] : memref<19x128xf32, #tpu.memory_space<vmem>>, vector<1x32xf32>
    %cst_12 = arith.constant dense<0.000000e+00> : vector<32xf32>
    %32 = vector.multi_reduction <add>, %4, %cst_12 [1] : vector<32x32xf32> to vector<32xf32>
    %33 = vector.shape_cast %32 : vector<32xf32> to vector<32x1xf32>
    %34 = arith.mulf %4, %4 : vector<32x32xf32>
    %cst_13 = arith.constant dense<0.000000e+00> : vector<32xf32>
    %35 = vector.multi_reduction <add>, %34, %cst_13 [1] : vector<32x32xf32> to vector<32xf32>
    %36 = vector.shape_cast %35 : vector<32xf32> to vector<32x1xf32>
    %cst_14 = arith.constant 3.125000e-02 : f32
    %37 = vector.broadcast %cst_14 : f32 to vector<32x1xf32>
    %38 = arith.mulf %33, %37 : vector<32x1xf32>
    %cst_15 = arith.constant 3.125000e-02 : f32
    %39 = vector.broadcast %cst_15 : f32 to vector<32x1xf32>
    %40 = arith.mulf %36, %39 : vector<32x1xf32>
    %41 = arith.mulf %38, %38 : vector<32x1xf32>
    %42 = arith.subf %40, %41 : vector<32x1xf32>
    %43 = vector.broadcast %38 : vector<32x1xf32> to vector<32x32xf32>
    %44 = arith.subf %4, %43 : vector<32x32xf32>
    %cst_16 = arith.constant 9.99999974E-6 : f32
    %45 = vector.broadcast %cst_16 : f32 to vector<32x1xf32>
    %46 = arith.addf %42, %45 : vector<32x1xf32>
    %47 = math.rsqrt %46 : vector<32x1xf32>
    %48 = vector.broadcast %47 : vector<32x1xf32> to vector<32x32xf32>
    %49 = arith.mulf %44, %48 : vector<32x32xf32>
    %50 = vector.broadcast %30 : vector<1x32xf32> to vector<32x32xf32>
    %51 = arith.mulf %49, %50 : vector<32x32xf32>
    %52 = vector.broadcast %31 : vector<1x32xf32> to vector<32x32xf32>
    %53 = arith.addf %51, %52 : vector<32x32xf32>
    %c0_17 = arith.constant 0 : index
    %c0_18 = arith.constant 0 : index
    %54 = vector.load %arg4[%c0_17, %c0_18] : memref<64x128xf32, #tpu.memory_space<vmem>>, vector<32x128xf32>
    %55 = vector.extract_strided_slice %54 {offsets = [0, 0], sizes = [32, 96], strides = [1, 1]} : vector<32x128xf32> to vector<32x96xf32>
    %cst_19 = arith.constant dense<0.000000e+00> : vector<32x96xf32>
    %56 = tpu.matmul %53, %55, %cst_19 {dimension_numbers = #tpu.dot_dimension_numbers<[1], [0], [0], [1], [0, 0, 1, 1], [], []>} : vector<32x32xf32>, vector<32x96xf32>, vector<32x96xf32> -> vector<32x96xf32>
    %c4 = arith.constant 4 : index
    %c0_20 = arith.constant 0 : index
    %57 = vector.load %arg7[%c4, %c0_20] : memref<19x128xf32, #tpu.memory_space<vmem>>, vector<1x96xf32>
    %58 = vector.broadcast %57 : vector<1x96xf32> to vector<32x96xf32>
    %59 = arith.addf %56, %58 : vector<32x96xf32>
    %60 = vector.extract_strided_slice %59 {offsets = [0, 0], sizes = [16, 16], strides = [1, 1]} : vector<32x96xf32> to vector<16x16xf32>
    %61 = vector.extract_strided_slice %59 {offsets = [0, 32], sizes = [16, 16], strides = [1, 1]} : vector<32x96xf32> to vector<16x16xf32>
    %62 = vector.extract_strided_slice %59 {offsets = [0, 64], sizes = [16, 16], strides = [1, 1]} : vector<32x96xf32> to vector<16x16xf32>
    %63 = vector.extract_strided_slice %59 {offsets = [0, 16], sizes = [16, 16], strides = [1, 1]} : vector<32x96xf32> to vector<16x16xf32>
    %64 = vector.extract_strided_slice %59 {offsets = [0, 48], sizes = [16, 16], strides = [1, 1]} : vector<32x96xf32> to vector<16x16xf32>
    %65 = vector.extract_strided_slice %59 {offsets = [0, 80], sizes = [16, 16], strides = [1, 1]} : vector<32x96xf32> to vector<16x16xf32>
    %66 = vector.extract_strided_slice %59 {offsets = [16, 0], sizes = [16, 16], strides = [1, 1]} : vector<32x96xf32> to vector<16x16xf32>
    %67 = vector.extract_strided_slice %59 {offsets = [16, 32], sizes = [16, 16], strides = [1, 1]} : vector<32x96xf32> to vector<16x16xf32>
    %68 = vector.extract_strided_slice %59 {offsets = [16, 64], sizes = [16, 16], strides = [1, 1]} : vector<32x96xf32> to vector<16x16xf32>
    %69 = vector.extract_strided_slice %59 {offsets = [16, 16], sizes = [16, 16], strides = [1, 1]} : vector<32x96xf32> to vector<16x16xf32>
    %70 = vector.extract_strided_slice %59 {offsets = [16, 48], sizes = [16, 16], strides = [1, 1]} : vector<32x96xf32> to vector<16x16xf32>
    %71 = vector.extract_strided_slice %59 {offsets = [16, 80], sizes = [16, 16], strides = [1, 1]} : vector<32x96xf32> to vector<16x16xf32>
    %72 = tpu.concatenate %60, %63, %66, %69 in 0 : vector<16x16xf32>, vector<16x16xf32>, vector<16x16xf32>, vector<16x16xf32> -> vector<64x16xf32>
    %73 = tpu.concatenate %61, %64, %67, %70 in 0 : vector<16x16xf32>, vector<16x16xf32>, vector<16x16xf32>, vector<16x16xf32> -> vector<64x16xf32>
    %74 = tpu.concatenate %62, %65, %68, %71 in 0 : vector<16x16xf32>, vector<16x16xf32>, vector<16x16xf32>, vector<16x16xf32> -> vector<64x16xf32>
    %75 = tpu.transpose %73, [1, 0] : vector<64x16xf32> -> vector<16x64xf32>
    %cst_21 = arith.constant dense<0.000000e+00> : vector<64x64xf32>
    %76 = tpu.matmul %72, %75, %cst_21 {dimension_numbers = #tpu.dot_dimension_numbers<[1], [0], [0], [1], [0, 0, 1, 1], [], []>} : vector<64x16xf32>, vector<16x64xf32>, vector<64x64xf32> -> vector<64x64xf32>
    %c0_22 = arith.constant 0 : index
    %c0_23 = arith.constant 0 : index
    %77 = vector.load %arg1[%c0_22, %c0_23] : memref<64x64xf32, #tpu.memory_space<vmem>>, vector<64x64xf32>
    %78 = arith.addf %76, %77 : vector<64x64xf32>
    %cst_24 = arith.constant dense<0xFF800000> : vector<64xf32>
    %79 = vector.multi_reduction <maximumf>, %78, %cst_24 [1] : vector<64x64xf32> to vector<64xf32>
    %80 = vector.shape_cast %79 : vector<64xf32> to vector<64x1xf32>
    %81 = vector.broadcast %80 : vector<64x1xf32> to vector<64x64xf32>
    %82 = arith.subf %78, %81 : vector<64x64xf32>
    %83 = math.exp %82 : vector<64x64xf32>
    %cst_25 = arith.constant dense<0.000000e+00> : vector<64xf32>
    %84 = vector.multi_reduction <add>, %83, %cst_25 [1] : vector<64x64xf32> to vector<64xf32>
    %85 = vector.shape_cast %84 : vector<64xf32> to vector<64x1xf32>
    %86 = tpu.reciprocal %85 {approx = true} : vector<64x1xf32> -> vector<64x1xf32>
    %87 = vector.broadcast %86 : vector<64x1xf32> to vector<64x64xf32>
    %88 = arith.mulf %83, %87 : vector<64x64xf32>
    %cst_26 = arith.constant dense<0.000000e+00> : vector<64x16xf32>
    %89 = tpu.matmul %88, %74, %cst_26 {dimension_numbers = #tpu.dot_dimension_numbers<[1], [0], [0], [1], [0, 0, 1, 1], [], []>} : vector<64x64xf32>, vector<64x16xf32>, vector<64x16xf32> -> vector<64x16xf32>
    %90 = vector.extract_strided_slice %89 {offsets = [0, 0], sizes = [16, 16], strides = [1, 1]} : vector<64x16xf32> to vector<16x16xf32>
    %91 = vector.extract_strided_slice %89 {offsets = [16, 0], sizes = [16, 16], strides = [1, 1]} : vector<64x16xf32> to vector<16x16xf32>
    %92 = tpu.concatenate %90, %91 in 1 : vector<16x16xf32>, vector<16x16xf32> -> vector<16x32xf32>
    %93 = vector.extract_strided_slice %89 {offsets = [32, 0], sizes = [16, 16], strides = [1, 1]} : vector<64x16xf32> to vector<16x16xf32>
    %94 = vector.extract_strided_slice %89 {offsets = [48, 0], sizes = [16, 16], strides = [1, 1]} : vector<64x16xf32> to vector<16x16xf32>
    %95 = tpu.concatenate %93, %94 in 1 : vector<16x16xf32>, vector<16x16xf32> -> vector<16x32xf32>
    %96 = tpu.concatenate %92, %95 in 0 : vector<16x32xf32>, vector<16x32xf32> -> vector<32x32xf32>
    %97 = vector.extract_strided_slice %54 {offsets = [0, 96], sizes = [32, 32], strides = [1, 1]} : vector<32x128xf32> to vector<32x32xf32>
    %cst_27 = arith.constant dense<0.000000e+00> : vector<32x32xf32>
    %98 = tpu.matmul %96, %97, %cst_27 {dimension_numbers = #tpu.dot_dimension_numbers<[1], [0], [0], [1], [0, 0, 1, 1], [], []>} : vector<32x32xf32>, vector<32x32xf32>, vector<32x32xf32> -> vector<32x32xf32>
    %99 = arith.addf %4, %98 : vector<32x32xf32>
    %c5 = arith.constant 5 : index
    %c0_28 = arith.constant 0 : index
    %100 = vector.load %arg7[%c5, %c0_28] : memref<19x128xf32, #tpu.memory_space<vmem>>, vector<1x32xf32>
    %101 = vector.broadcast %100 : vector<1x32xf32> to vector<32x32xf32>
    %102 = arith.addf %99, %101 : vector<32x32xf32>
    %c2 = arith.constant 2 : index
    %c0_29 = arith.constant 0 : index
    %103 = vector.load %arg7[%c2, %c0_29] : memref<19x128xf32, #tpu.memory_space<vmem>>, vector<1x32xf32>
    %c3 = arith.constant 3 : index
    %c0_30 = arith.constant 0 : index
    %104 = vector.load %arg7[%c3, %c0_30] : memref<19x128xf32, #tpu.memory_space<vmem>>, vector<1x32xf32>
    %cst_31 = arith.constant dense<0.000000e+00> : vector<32xf32>
    %105 = vector.multi_reduction <add>, %102, %cst_31 [1] : vector<32x32xf32> to vector<32xf32>
    %106 = vector.shape_cast %105 : vector<32xf32> to vector<32x1xf32>
    %107 = arith.mulf %102, %102 : vector<32x32xf32>
    %cst_32 = arith.constant dense<0.000000e+00> : vector<32xf32>
    %108 = vector.multi_reduction <add>, %107, %cst_32 [1] : vector<32x32xf32> to vector<32xf32>
    %109 = vector.shape_cast %108 : vector<32xf32> to vector<32x1xf32>
    %cst_33 = arith.constant 3.125000e-02 : f32
    %110 = vector.broadcast %cst_33 : f32 to vector<32x1xf32>
    %111 = arith.mulf %106, %110 : vector<32x1xf32>
    %cst_34 = arith.constant 3.125000e-02 : f32
    %112 = vector.broadcast %cst_34 : f32 to vector<32x1xf32>
    %113 = arith.mulf %109, %112 : vector<32x1xf32>
    %114 = arith.mulf %111, %111 : vector<32x1xf32>
    %115 = arith.subf %113, %114 : vector<32x1xf32>
    %116 = vector.broadcast %111 : vector<32x1xf32> to vector<32x32xf32>
    %117 = arith.subf %102, %116 : vector<32x32xf32>
    %cst_35 = arith.constant 9.99999974E-6 : f32
    %118 = vector.broadcast %cst_35 : f32 to vector<32x1xf32>
    %119 = arith.addf %115, %118 : vector<32x1xf32>
    %120 = math.rsqrt %119 : vector<32x1xf32>
    %121 = vector.broadcast %120 : vector<32x1xf32> to vector<32x32xf32>
    %122 = arith.mulf %117, %121 : vector<32x32xf32>
    %123 = vector.broadcast %103 : vector<1x32xf32> to vector<32x32xf32>
    %124 = arith.mulf %122, %123 : vector<32x32xf32>
    %125 = vector.broadcast %104 : vector<1x32xf32> to vector<32x32xf32>
    %126 = arith.addf %124, %125 : vector<32x32xf32>
    %c0_36 = arith.constant 0 : index
    %c0_37 = arith.constant 0 : index
    %127 = vector.load %arg5[%c0_36, %c0_37] : memref<192x64xf32, #tpu.memory_space<vmem>>, vector<96x64xf32>
    %c6 = arith.constant 6 : index
    %c0_38 = arith.constant 0 : index
    %128 = vector.load %arg7[%c6, %c0_38] : memref<19x128xf32, #tpu.memory_space<vmem>>, vector<1x64xf32>
    %c1_i32_39 = arith.constant 1 : i32
    %129 = tpu.dynamic_rotate %126 by %c1_i32_39 dim 0 : vector<32x32xf32>, i32 -> vector<32x32xf32>
    %130 = vector.broadcast %25 : vector<32x1xf32> to vector<32x32xf32>
    %131 = arith.mulf %129, %130 : vector<32x32xf32>
    %c31_i32 = arith.constant 31 : i32
    %132 = tpu.dynamic_rotate %126 by %c31_i32 dim 0 : vector<32x32xf32>, i32 -> vector<32x32xf32>
    %133 = vector.broadcast %29 : vector<32x1xf32> to vector<32x32xf32>
    %134 = arith.mulf %132, %133 : vector<32x32xf32>
    %135 = tpu.concatenate %131, %126, %134 in 1 : vector<32x32xf32>, vector<32x32xf32>, vector<32x32xf32> -> vector<32x96xf32>
    %cst_40 = arith.constant dense<0.000000e+00> : vector<32x64xf32>
    %136 = tpu.matmul %135, %127, %cst_40 {dimension_numbers = #tpu.dot_dimension_numbers<[1], [0], [0], [1], [0, 0, 1, 1], [], []>} : vector<32x96xf32>, vector<96x64xf32>, vector<32x64xf32> -> vector<32x64xf32>
    %137 = vector.broadcast %128 : vector<1x64xf32> to vector<32x64xf32>
    %138 = arith.addf %136, %137 : vector<32x64xf32>
    %cst_41 = arith.constant 0.000000e+00 : f32
    %139 = vector.broadcast %cst_41 : f32 to vector<32x64xf32>
    %140 = arith.maximumf %138, %139 : vector<32x64xf32>
    %c0_42 = arith.constant 0 : index
    %c0_43 = arith.constant 0 : index
    %141 = vector.load %arg6[%c0_42, %c0_43] : memref<384x32xf32, #tpu.memory_space<vmem>>, vector<192x32xf32>
    %c7 = arith.constant 7 : index
    %c0_44 = arith.constant 0 : index
    %142 = vector.load %arg7[%c7, %c0_44] : memref<19x128xf32, #tpu.memory_space<vmem>>, vector<1x32xf32>
    %c1_i32_45 = arith.constant 1 : i32
    %143 = tpu.dynamic_rotate %140 by %c1_i32_45 dim 0 : vector<32x64xf32>, i32 -> vector<32x64xf32>
    %144 = vector.broadcast %25 : vector<32x1xf32> to vector<32x64xf32>
    %145 = arith.mulf %143, %144 : vector<32x64xf32>
    %c31_i32_46 = arith.constant 31 : i32
    %146 = tpu.dynamic_rotate %140 by %c31_i32_46 dim 0 : vector<32x64xf32>, i32 -> vector<32x64xf32>
    %147 = vector.broadcast %29 : vector<32x1xf32> to vector<32x64xf32>
    %148 = arith.mulf %146, %147 : vector<32x64xf32>
    %149 = tpu.concatenate %145, %140, %148 in 1 : vector<32x64xf32>, vector<32x64xf32>, vector<32x64xf32> -> vector<32x192xf32>
    %cst_47 = arith.constant dense<0.000000e+00> : vector<32x32xf32>
    %150 = tpu.matmul %149, %141, %cst_47 {dimension_numbers = #tpu.dot_dimension_numbers<[1], [0], [0], [1], [0, 0, 1, 1], [], []>} : vector<32x192xf32>, vector<192x32xf32>, vector<32x32xf32> -> vector<32x32xf32>
    %151 = vector.broadcast %142 : vector<1x32xf32> to vector<32x32xf32>
    %152 = arith.addf %150, %151 : vector<32x32xf32>
    %153 = arith.addf %102, %152 : vector<32x32xf32>
    %c8 = arith.constant 8 : index
    %c0_48 = arith.constant 0 : index
    %154 = vector.load %arg7[%c8, %c0_48] : memref<19x128xf32, #tpu.memory_space<vmem>>, vector<1x32xf32>
    %c9 = arith.constant 9 : index
    %c0_49 = arith.constant 0 : index
    %155 = vector.load %arg7[%c9, %c0_49] : memref<19x128xf32, #tpu.memory_space<vmem>>, vector<1x32xf32>
    %cst_50 = arith.constant dense<0.000000e+00> : vector<32xf32>
    %156 = vector.multi_reduction <add>, %153, %cst_50 [1] : vector<32x32xf32> to vector<32xf32>
    %157 = vector.shape_cast %156 : vector<32xf32> to vector<32x1xf32>
    %158 = arith.mulf %153, %153 : vector<32x32xf32>
    %cst_51 = arith.constant dense<0.000000e+00> : vector<32xf32>
    %159 = vector.multi_reduction <add>, %158, %cst_51 [1] : vector<32x32xf32> to vector<32xf32>
    %160 = vector.shape_cast %159 : vector<32xf32> to vector<32x1xf32>
    %cst_52 = arith.constant 3.125000e-02 : f32
    %161 = vector.broadcast %cst_52 : f32 to vector<32x1xf32>
    %162 = arith.mulf %157, %161 : vector<32x1xf32>
    %cst_53 = arith.constant 3.125000e-02 : f32
    %163 = vector.broadcast %cst_53 : f32 to vector<32x1xf32>
    %164 = arith.mulf %160, %163 : vector<32x1xf32>
    %165 = arith.mulf %162, %162 : vector<32x1xf32>
    %166 = arith.subf %164, %165 : vector<32x1xf32>
    %167 = vector.broadcast %162 : vector<32x1xf32> to vector<32x32xf32>
    %168 = arith.subf %153, %167 : vector<32x32xf32>
    %cst_54 = arith.constant 9.99999974E-6 : f32
    %169 = vector.broadcast %cst_54 : f32 to vector<32x1xf32>
    %170 = arith.addf %166, %169 : vector<32x1xf32>
    %171 = math.rsqrt %170 : vector<32x1xf32>
    %172 = vector.broadcast %171 : vector<32x1xf32> to vector<32x32xf32>
    %173 = arith.mulf %168, %172 : vector<32x32xf32>
    %174 = vector.broadcast %154 : vector<1x32xf32> to vector<32x32xf32>
    %175 = arith.mulf %173, %174 : vector<32x32xf32>
    %176 = vector.broadcast %155 : vector<1x32xf32> to vector<32x32xf32>
    %177 = arith.addf %175, %176 : vector<32x32xf32>
    %c32 = arith.constant 32 : index
    %c0_55 = arith.constant 0 : index
    %178 = vector.load %arg4[%c32, %c0_55] : memref<64x128xf32, #tpu.memory_space<vmem>>, vector<32x128xf32>
    %179 = vector.extract_strided_slice %178 {offsets = [0, 0], sizes = [32, 96], strides = [1, 1]} : vector<32x128xf32> to vector<32x96xf32>
    %cst_56 = arith.constant dense<0.000000e+00> : vector<32x96xf32>
    %180 = tpu.matmul %177, %179, %cst_56 {dimension_numbers = #tpu.dot_dimension_numbers<[1], [0], [0], [1], [0, 0, 1, 1], [], []>} : vector<32x32xf32>, vector<32x96xf32>, vector<32x96xf32> -> vector<32x96xf32>
    %c12 = arith.constant 12 : index
    %c0_57 = arith.constant 0 : index
    %181 = vector.load %arg7[%c12, %c0_57] : memref<19x128xf32, #tpu.memory_space<vmem>>, vector<1x96xf32>
    %182 = vector.broadcast %181 : vector<1x96xf32> to vector<32x96xf32>
    %183 = arith.addf %180, %182 : vector<32x96xf32>
    %184 = vector.extract_strided_slice %183 {offsets = [0, 0], sizes = [16, 16], strides = [1, 1]} : vector<32x96xf32> to vector<16x16xf32>
    %185 = vector.extract_strided_slice %183 {offsets = [0, 32], sizes = [16, 16], strides = [1, 1]} : vector<32x96xf32> to vector<16x16xf32>
    %186 = vector.extract_strided_slice %183 {offsets = [0, 64], sizes = [16, 16], strides = [1, 1]} : vector<32x96xf32> to vector<16x16xf32>
    %187 = vector.extract_strided_slice %183 {offsets = [0, 16], sizes = [16, 16], strides = [1, 1]} : vector<32x96xf32> to vector<16x16xf32>
    %188 = vector.extract_strided_slice %183 {offsets = [0, 48], sizes = [16, 16], strides = [1, 1]} : vector<32x96xf32> to vector<16x16xf32>
    %189 = vector.extract_strided_slice %183 {offsets = [0, 80], sizes = [16, 16], strides = [1, 1]} : vector<32x96xf32> to vector<16x16xf32>
    %190 = vector.extract_strided_slice %183 {offsets = [16, 0], sizes = [16, 16], strides = [1, 1]} : vector<32x96xf32> to vector<16x16xf32>
    %191 = vector.extract_strided_slice %183 {offsets = [16, 32], sizes = [16, 16], strides = [1, 1]} : vector<32x96xf32> to vector<16x16xf32>
    %192 = vector.extract_strided_slice %183 {offsets = [16, 64], sizes = [16, 16], strides = [1, 1]} : vector<32x96xf32> to vector<16x16xf32>
    %193 = vector.extract_strided_slice %183 {offsets = [16, 16], sizes = [16, 16], strides = [1, 1]} : vector<32x96xf32> to vector<16x16xf32>
    %194 = vector.extract_strided_slice %183 {offsets = [16, 48], sizes = [16, 16], strides = [1, 1]} : vector<32x96xf32> to vector<16x16xf32>
    %195 = vector.extract_strided_slice %183 {offsets = [16, 80], sizes = [16, 16], strides = [1, 1]} : vector<32x96xf32> to vector<16x16xf32>
    %196 = tpu.concatenate %184, %187, %190, %193 in 0 : vector<16x16xf32>, vector<16x16xf32>, vector<16x16xf32>, vector<16x16xf32> -> vector<64x16xf32>
    %197 = tpu.concatenate %185, %188, %191, %194 in 0 : vector<16x16xf32>, vector<16x16xf32>, vector<16x16xf32>, vector<16x16xf32> -> vector<64x16xf32>
    %198 = tpu.concatenate %186, %189, %192, %195 in 0 : vector<16x16xf32>, vector<16x16xf32>, vector<16x16xf32>, vector<16x16xf32> -> vector<64x16xf32>
    %199 = tpu.transpose %197, [1, 0] : vector<64x16xf32> -> vector<16x64xf32>
    %cst_58 = arith.constant dense<0.000000e+00> : vector<64x64xf32>
    %200 = tpu.matmul %196, %199, %cst_58 {dimension_numbers = #tpu.dot_dimension_numbers<[1], [0], [0], [1], [0, 0, 1, 1], [], []>} : vector<64x16xf32>, vector<16x64xf32>, vector<64x64xf32> -> vector<64x64xf32>
    %c0_59 = arith.constant 0 : index
    %c0_60 = arith.constant 0 : index
    %201 = vector.load %arg1[%c0_59, %c0_60] : memref<64x64xf32, #tpu.memory_space<vmem>>, vector<64x64xf32>
    %202 = arith.addf %200, %201 : vector<64x64xf32>
    %cst_61 = arith.constant dense<0xFF800000> : vector<64xf32>
    %203 = vector.multi_reduction <maximumf>, %202, %cst_61 [1] : vector<64x64xf32> to vector<64xf32>
    %204 = vector.shape_cast %203 : vector<64xf32> to vector<64x1xf32>
    %205 = vector.broadcast %204 : vector<64x1xf32> to vector<64x64xf32>
    %206 = arith.subf %202, %205 : vector<64x64xf32>
    %207 = math.exp %206 : vector<64x64xf32>
    %cst_62 = arith.constant dense<0.000000e+00> : vector<64xf32>
    %208 = vector.multi_reduction <add>, %207, %cst_62 [1] : vector<64x64xf32> to vector<64xf32>
    %209 = vector.shape_cast %208 : vector<64xf32> to vector<64x1xf32>
    %210 = tpu.reciprocal %209 {approx = true} : vector<64x1xf32> -> vector<64x1xf32>
    %211 = vector.broadcast %210 : vector<64x1xf32> to vector<64x64xf32>
    %212 = arith.mulf %207, %211 : vector<64x64xf32>
    %cst_63 = arith.constant dense<0.000000e+00> : vector<64x16xf32>
    %213 = tpu.matmul %212, %198, %cst_63 {dimension_numbers = #tpu.dot_dimension_numbers<[1], [0], [0], [1], [0, 0, 1, 1], [], []>} : vector<64x64xf32>, vector<64x16xf32>, vector<64x16xf32> -> vector<64x16xf32>
    %214 = vector.extract_strided_slice %213 {offsets = [0, 0], sizes = [16, 16], strides = [1, 1]} : vector<64x16xf32> to vector<16x16xf32>
    %215 = vector.extract_strided_slice %213 {offsets = [16, 0], sizes = [16, 16], strides = [1, 1]} : vector<64x16xf32> to vector<16x16xf32>
    %216 = tpu.concatenate %214, %215 in 1 : vector<16x16xf32>, vector<16x16xf32> -> vector<16x32xf32>
    %217 = vector.extract_strided_slice %213 {offsets = [32, 0], sizes = [16, 16], strides = [1, 1]} : vector<64x16xf32> to vector<16x16xf32>
    %218 = vector.extract_strided_slice %213 {offsets = [48, 0], sizes = [16, 16], strides = [1, 1]} : vector<64x16xf32> to vector<16x16xf32>
    %219 = tpu.concatenate %217, %218 in 1 : vector<16x16xf32>, vector<16x16xf32> -> vector<16x32xf32>
    %220 = tpu.concatenate %216, %219 in 0 : vector<16x32xf32>, vector<16x32xf32> -> vector<32x32xf32>
    %221 = vector.extract_strided_slice %178 {offsets = [0, 96], sizes = [32, 32], strides = [1, 1]} : vector<32x128xf32> to vector<32x32xf32>
    %cst_64 = arith.constant dense<0.000000e+00> : vector<32x32xf32>
    %222 = tpu.matmul %220, %221, %cst_64 {dimension_numbers = #tpu.dot_dimension_numbers<[1], [0], [0], [1], [0, 0, 1, 1], [], []>} : vector<32x32xf32>, vector<32x32xf32>, vector<32x32xf32> -> vector<32x32xf32>
    %223 = arith.addf %153, %222 : vector<32x32xf32>
    %c13 = arith.constant 13 : index
    %c0_65 = arith.constant 0 : index
    %224 = vector.load %arg7[%c13, %c0_65] : memref<19x128xf32, #tpu.memory_space<vmem>>, vector<1x32xf32>
    %225 = vector.broadcast %224 : vector<1x32xf32> to vector<32x32xf32>
    %226 = arith.addf %223, %225 : vector<32x32xf32>
    %c10 = arith.constant 10 : index
    %c0_66 = arith.constant 0 : index
    %227 = vector.load %arg7[%c10, %c0_66] : memref<19x128xf32, #tpu.memory_space<vmem>>, vector<1x32xf32>
    %c11 = arith.constant 11 : index
    %c0_67 = arith.constant 0 : index
    %228 = vector.load %arg7[%c11, %c0_67] : memref<19x128xf32, #tpu.memory_space<vmem>>, vector<1x32xf32>
    %cst_68 = arith.constant dense<0.000000e+00> : vector<32xf32>
    %229 = vector.multi_reduction <add>, %226, %cst_68 [1] : vector<32x32xf32> to vector<32xf32>
    %230 = vector.shape_cast %229 : vector<32xf32> to vector<32x1xf32>
    %231 = arith.mulf %226, %226 : vector<32x32xf32>
    %cst_69 = arith.constant dense<0.000000e+00> : vector<32xf32>
    %232 = vector.multi_reduction <add>, %231, %cst_69 [1] : vector<32x32xf32> to vector<32xf32>
    %233 = vector.shape_cast %232 : vector<32xf32> to vector<32x1xf32>
    %cst_70 = arith.constant 3.125000e-02 : f32
    %234 = vector.broadcast %cst_70 : f32 to vector<32x1xf32>
    %235 = arith.mulf %230, %234 : vector<32x1xf32>
    %cst_71 = arith.constant 3.125000e-02 : f32
    %236 = vector.broadcast %cst_71 : f32 to vector<32x1xf32>
    %237 = arith.mulf %233, %236 : vector<32x1xf32>
    %238 = arith.mulf %235, %235 : vector<32x1xf32>
    %239 = arith.subf %237, %238 : vector<32x1xf32>
    %240 = vector.broadcast %235 : vector<32x1xf32> to vector<32x32xf32>
    %241 = arith.subf %226, %240 : vector<32x32xf32>
    %cst_72 = arith.constant 9.99999974E-6 : f32
    %242 = vector.broadcast %cst_72 : f32 to vector<32x1xf32>
    %243 = arith.addf %239, %242 : vector<32x1xf32>
    %244 = math.rsqrt %243 : vector<32x1xf32>
    %245 = vector.broadcast %244 : vector<32x1xf32> to vector<32x32xf32>
    %246 = arith.mulf %241, %245 : vector<32x32xf32>
    %247 = vector.broadcast %227 : vector<1x32xf32> to vector<32x32xf32>
    %248 = arith.mulf %246, %247 : vector<32x32xf32>
    %249 = vector.broadcast %228 : vector<1x32xf32> to vector<32x32xf32>
    %250 = arith.addf %248, %249 : vector<32x32xf32>
    %c96 = arith.constant 96 : index
    %c0_73 = arith.constant 0 : index
    %251 = vector.load %arg5[%c96, %c0_73] : memref<192x64xf32, #tpu.memory_space<vmem>>, vector<96x64xf32>
    %c14 = arith.constant 14 : index
    %c0_74 = arith.constant 0 : index
    %252 = vector.load %arg7[%c14, %c0_74] : memref<19x128xf32, #tpu.memory_space<vmem>>, vector<1x64xf32>
    %c1_i32_75 = arith.constant 1 : i32
    %253 = tpu.dynamic_rotate %250 by %c1_i32_75 dim 0 : vector<32x32xf32>, i32 -> vector<32x32xf32>
    %254 = vector.broadcast %25 : vector<32x1xf32> to vector<32x32xf32>
    %255 = arith.mulf %253, %254 : vector<32x32xf32>
    %c31_i32_76 = arith.constant 31 : i32
    %256 = tpu.dynamic_rotate %250 by %c31_i32_76 dim 0 : vector<32x32xf32>, i32 -> vector<32x32xf32>
    %257 = vector.broadcast %29 : vector<32x1xf32> to vector<32x32xf32>
    %258 = arith.mulf %256, %257 : vector<32x32xf32>
    %259 = tpu.concatenate %255, %250, %258 in 1 : vector<32x32xf32>, vector<32x32xf32>, vector<32x32xf32> -> vector<32x96xf32>
    %cst_77 = arith.constant dense<0.000000e+00> : vector<32x64xf32>
    %260 = tpu.matmul %259, %251, %cst_77 {dimension_numbers = #tpu.dot_dimension_numbers<[1], [0], [0], [1], [0, 0, 1, 1], [], []>} : vector<32x96xf32>, vector<96x64xf32>, vector<32x64xf32> -> vector<32x64xf32>
    %261 = vector.broadcast %252 : vector<1x64xf32> to vector<32x64xf32>
    %262 = arith.addf %260, %261 : vector<32x64xf32>
    %cst_78 = arith.constant 0.000000e+00 : f32
    %263 = vector.broadcast %cst_78 : f32 to vector<32x64xf32>
    %264 = arith.maximumf %262, %263 : vector<32x64xf32>
    %c192 = arith.constant 192 : index
    %c0_79 = arith.constant 0 : index
    %265 = vector.load %arg6[%c192, %c0_79] : memref<384x32xf32, #tpu.memory_space<vmem>>, vector<192x32xf32>
    %c15 = arith.constant 15 : index
    %c0_80 = arith.constant 0 : index
    %266 = vector.load %arg7[%c15, %c0_80] : memref<19x128xf32, #tpu.memory_space<vmem>>, vector<1x32xf32>
    %c1_i32_81 = arith.constant 1 : i32
    %267 = tpu.dynamic_rotate %264 by %c1_i32_81 dim 0 : vector<32x64xf32>, i32 -> vector<32x64xf32>
    %268 = vector.broadcast %25 : vector<32x1xf32> to vector<32x64xf32>
    %269 = arith.mulf %267, %268 : vector<32x64xf32>
    %c31_i32_82 = arith.constant 31 : i32
    %270 = tpu.dynamic_rotate %264 by %c31_i32_82 dim 0 : vector<32x64xf32>, i32 -> vector<32x64xf32>
    %271 = vector.broadcast %29 : vector<32x1xf32> to vector<32x64xf32>
    %272 = arith.mulf %270, %271 : vector<32x64xf32>
    %273 = tpu.concatenate %269, %264, %272 in 1 : vector<32x64xf32>, vector<32x64xf32>, vector<32x64xf32> -> vector<32x192xf32>
    %cst_83 = arith.constant dense<0.000000e+00> : vector<32x32xf32>
    %274 = tpu.matmul %273, %265, %cst_83 {dimension_numbers = #tpu.dot_dimension_numbers<[1], [0], [0], [1], [0, 0, 1, 1], [], []>} : vector<32x192xf32>, vector<192x32xf32>, vector<32x32xf32> -> vector<32x32xf32>
    %275 = vector.broadcast %266 : vector<1x32xf32> to vector<32x32xf32>
    %276 = arith.addf %274, %275 : vector<32x32xf32>
    %277 = arith.addf %226, %276 : vector<32x32xf32>
    %c16 = arith.constant 16 : index
    %c0_84 = arith.constant 0 : index
    %278 = vector.load %arg7[%c16, %c0_84] : memref<19x128xf32, #tpu.memory_space<vmem>>, vector<1x32xf32>
    %c17 = arith.constant 17 : index
    %c0_85 = arith.constant 0 : index
    %279 = vector.load %arg7[%c17, %c0_85] : memref<19x128xf32, #tpu.memory_space<vmem>>, vector<1x32xf32>
    %cst_86 = arith.constant dense<0.000000e+00> : vector<32xf32>
    %280 = vector.multi_reduction <add>, %277, %cst_86 [1] : vector<32x32xf32> to vector<32xf32>
    %281 = vector.shape_cast %280 : vector<32xf32> to vector<32x1xf32>
    %282 = arith.mulf %277, %277 : vector<32x32xf32>
    %cst_87 = arith.constant dense<0.000000e+00> : vector<32xf32>
    %283 = vector.multi_reduction <add>, %282, %cst_87 [1] : vector<32x32xf32> to vector<32xf32>
    %284 = vector.shape_cast %283 : vector<32xf32> to vector<32x1xf32>
    %cst_88 = arith.constant 3.125000e-02 : f32
    %285 = vector.broadcast %cst_88 : f32 to vector<32x1xf32>
    %286 = arith.mulf %281, %285 : vector<32x1xf32>
    %cst_89 = arith.constant 3.125000e-02 : f32
    %287 = vector.broadcast %cst_89 : f32 to vector<32x1xf32>
    %288 = arith.mulf %284, %287 : vector<32x1xf32>
    %289 = arith.mulf %286, %286 : vector<32x1xf32>
    %290 = arith.subf %288, %289 : vector<32x1xf32>
    %291 = vector.broadcast %286 : vector<32x1xf32> to vector<32x32xf32>
    %292 = arith.subf %277, %291 : vector<32x32xf32>
    %cst_90 = arith.constant 9.99999974E-6 : f32
    %293 = vector.broadcast %cst_90 : f32 to vector<32x1xf32>
    %294 = arith.addf %290, %293 : vector<32x1xf32>
    %295 = math.rsqrt %294 : vector<32x1xf32>
    %296 = vector.broadcast %295 : vector<32x1xf32> to vector<32x32xf32>
    %297 = arith.mulf %292, %296 : vector<32x32xf32>
    %298 = vector.broadcast %278 : vector<1x32xf32> to vector<32x32xf32>
    %299 = arith.mulf %297, %298 : vector<32x32xf32>
    %300 = vector.broadcast %279 : vector<1x32xf32> to vector<32x32xf32>
    %301 = arith.addf %299, %300 : vector<32x32xf32>
    %c0_91 = arith.constant 0 : index
    %c0_92 = arith.constant 0 : index
    %302 = vector.load %arg8[%c0_91, %c0_92] : memref<32x8xf32, #tpu.memory_space<vmem>>, vector<32x8xf32>
    %cst_93 = arith.constant dense<0.000000e+00> : vector<32x8xf32>
    %303 = tpu.matmul %301, %302, %cst_93 {dimension_numbers = #tpu.dot_dimension_numbers<[1], [0], [0], [1], [0, 0, 1, 1], [], []>} : vector<32x32xf32>, vector<32x8xf32>, vector<32x8xf32> -> vector<32x8xf32>
    %c18 = arith.constant 18 : index
    %c0_94 = arith.constant 0 : index
    %304 = vector.load %arg7[%c18, %c0_94] : memref<19x128xf32, #tpu.memory_space<vmem>>, vector<1x8xf32>
    %305 = vector.broadcast %304 : vector<1x8xf32> to vector<32x8xf32>
    %306 = arith.addf %303, %305 : vector<32x8xf32>
    %c0_95 = arith.constant 0 : index
    %c0_96 = arith.constant 0 : index
    %307 = vector.load %arg9[%c0_95, %c0_96] : memref<32x8xf32, #tpu.memory_space<vmem>>, vector<32x8xf32>
    tpu.vector_store %arg9[%c0_95, %c0_96], %306 {strides = array<i32>} : memref<32x8xf32, #tpu.memory_space<vmem>>, vector<32x8xf32>,
    return
  }
}

</mosaic_0001>

<bundles_post_ra>
// kernel: tpu_custom_call.1
= control target key start
LH: loop header
LB: loop body
LE: loop exit
PB: predicated region body
PF: predicated region fallthrough
CT: control target
= control target key end

     0   :  { %vm41_vm0 = vcmask 64512   ;;  %vm218_vm1 = vcmask 261120   ;;  %vm437_vm2 = vcmask 130048   ;;  %s3383_s17 = smov 96   ;;  %vm575_vm3 = vcmask 523264   ;;  %s3384_s11 = smov 64   ;;  %s4570_s3 = inlined_call_operand.vmem [shape: f32[8,32], index: 3, kind: input, shape index: {}]   ;;  %s4571_s0 = inlined_call_operand.vmem [shape: f32[32,8], index: 0, kind: input, shape index: {}]   ;;  %s4572_s2 = inlined_call_operand.vmem [shape: f32[32,32], index: 2, kind: input, shape index: {}]   ;;  %s4573_s4 = inlined_call_operand.vmem [shape: f32[64,128], index: 4, kind: input, shape index: {}]   ;;  %s4574_s7 = inlined_call_operand.vmem [shape: f32[19,128], index: 7, kind: input, shape index: {}]   ;;  %s4575_s1 = inlined_call_operand.vmem [shape: f32[64,64], index: 1, kind: input, shape index: {}]   ;;  %s4576_s5 = inlined_call_operand.vmem [shape: f32[192,64], index: 5, kind: input, shape index: {}]   ;;  %s4577_s6 = inlined_call_operand.vmem [shape: f32[384,32], index: 6, kind: input, shape index: {}]   ;;  %s4578_s8 = inlined_call_operand.vmem [shape: f32[32,8], index: 8, kind: input, shape index: {}]   ;;  %s4579_s9 = inlined_call_operand.vmem [shape: f32[32,8], index: 9, kind: output, shape index: {}]  }
   0x1   :  { %v36_v0 = vld [vmem:[%s4570_s3] sm:$0xff]  ;;  %v33_v2 = vld [vmem:[%s4571_s0 + $0x8] sm:$0xff]  ;;  %v34_v3 = vld [vmem:[%s4571_s0 + $0x10] sm:$0xff]  ;;  %s3382_s3 = smov 112   ;;  %s3385_s12 = smov 32   ;;  %vm1124_vm10 = vcmask 785408  }
   0x2   :  { %v32_v1 = vld [vmem:[%s4571_s0] sm:$0xff]  ;;  %3014 = vmatprep.subr.mxu0 %v36_v0  ;;  %v35_v4 = vld [vmem:[%s4571_s0 + $0x18] sm:$0xff]  ;;  %v38_v5 = vld [vmem:[%s4572_s2 + $0x8] sm:$0xff]  ;;  %s3386_s13 = smov 16  }
   0x3   :  { %3016 = vmatprep.mubr.msk.f32.mxu0 %vm41_vm0, %v32_v1  ;;  %3015 = vmatpush3.msra.mxu0 %v36_v0  ;;  %v37_v7 = vld [vmem:[%s4572_s2] sm:$0xff]  ;;  %v39_v14 = vld [vmem:[%s4572_s2 + $0x10] sm:$0xff]  ;;  %v40_v17 = vld [vmem:[%s4572_s2 + $0x18] sm:$0xff] }
   0x4   :  { %3017 = vmatmul.mubr.msk.f32.vlgmr.msra.gmra.mxu0 %vm41_vm0, %v33_v2  ;;  %v3500_v29 = vld [vmem:[%s4573_s4 + $0x18] sm:$0xff]  ;;  %v3505_v30 = vld [vmem:[%s4573_s4 + $0x10] sm:$0xff]  ;;  %v3512_v31 = vld [vmem:[%s4573_s4 + $0x8] sm:$0xff] }
   0x5   :  { %3019 = vmatprep.mubr.msk.f32.mxu0 %vm41_vm0, %v34_v3  ;;  %3022 = vmatprep.subr.mxu1 %v3500_v29  ;;  %v3519_v32 = vld [vmem:[%s4573_s4] sm:$0xff] }
   0x6   :  { %3023 = vmatpush3.msra.mxu1 %v3500_v29  ;;  %v2770_v1 = vld [vmem:[%s4574_s7] ss:$0 sm:$0xff] }
   0x7   :  { %3024 = vmatprep.subr.mxu1 %v3505_v30 }
   0x8   :  { %3020 = vmatmul.mubr.msk.f32.gmra.mxu0 %vm41_vm0, %v35_v4  ;;  %3025 = vmatpush3.msra.mxu1 %v3505_v30 }
   0x9   :  { %3026 = vmatprep.subr.mxu1 %v3512_v31 }
   0xa   :  { %3027 = vmatpush3.msra.mxu1 %v3512_v31 }
   0xb   :  { %3028 = vmatprep.subr.mxu1 %v3519_v32 }
   0xc   :  { %3029 = vmatpush3.msra.mxu1 %v3519_v32 }
  0xc4   :  { %v3018_v6 = vpop.f32.mrf.mxu0 }
  0xc5   :  { %v3463_v8 = vadd.f32 %v3018_v6, %v38_v5  ;;  %v2771_v5 = vld [vmem:[%s4574_s7 + $0x1] ss:$0 sm:$0xff] }
  0xc6   :  { %v120_v9 = vpop.f32.mrf.mxu0 }
  0xc7   :  { %v3465_v10 = vadd.f32 %v120_v9, %v37_v7  ;;  %v222_v11 = vsel %vm218_vm1, %v3463_v8, 0.0  ;;  %v232_v12 = vmul.f32 %v3463_v8, %v3463_v8 }
  0xc8   :  { %223 = vadd.xlane.f32.xlu0 %v222_v11  ;;  %v3021_v13 = vpop.f32.mrf.mxu0 }
  0xc9   :  { %v238_v15 = vsel %vm218_vm1, %v232_v12, 0.0  ;;  %v231_v16 = vmul.f32 %v3465_v10, %v3465_v10  ;;  %v219_v20 = vsel %vm218_vm1, %v3465_v10, 0.0  ;;  %v3484_v21 = vadd.f32 %v3021_v13, %v40_v17 }
  0xca   :  { %239 = vadd.xlane.f32.xlu1 %v238_v15  ;;  %v130_v18 = vpop.f32.mrf.mxu0 }
  0xcb   :  { %v3480_v19 = vadd.f32 %v130_v18, %v39_v14  ;;  %v235_v22 = vsel %vm218_vm1, %v231_v16, 0.0  ;;  %v228_v25 = vsel %vm218_vm1, %v3484_v21, 0.0  ;;  %v234_v26 = vmul.f32 %v3484_v21, %v3484_v21 }
  0xcc   :  { %220 = vadd.xlane.f32.xlu0 %v219_v20 }
  0xcd   :  { %v225_v23 = vsel %vm218_vm1, %v3480_v19, 0.0  ;;  %v233_v24 = vmul.f32 %v3480_v19, %v3480_v19  ;;  %v244_v28 = vsel %vm218_vm1, %v234_v26, 0.0 }
  0xce   :  { %236 = vadd.xlane.f32.xlu1 %v235_v22 }
  0xcf   :  { %v241_v27 = vsel %vm218_vm1, %v233_v24, 0.0  ;;  %v2772_v24 = vld [vmem:[%s4574_s7 + $0x4] ss:$0 sm:$0xff] }
  0xd0   :  { %226 = vadd.xlane.f32.xlu0 %v225_v23 }
  0xd2   :  { %229 = vadd.xlane.f32.xlu1 %v228_v25 }
  0xd4   :  { %242 = vadd.xlane.f32.xlu0 %v241_v27 }
  0xd6   :  { %245 = vadd.xlane.f32.xlu1 %v244_v28 }
 0x151   :  { %v224_v33 = vpop.xlane.xlu0 %223 }
 0x152   :  { %v248_v34 = vmul.f32 0.03125, %v224_v33 }
 0x153   :  { %v240_v35 = vpop.xlane.xlu1 %239 }
 0x154   :  { %v256_v36 = vmul.f32 %v248_v34, %v248_v34  ;;  %v252_v37 = vmul.f32 0.03125, %v240_v35  ;;  %v264_v62 = vsub.f32 %v3463_v8, %v248_v34 }
 0x155   :  { %v221_v38 = vpop.xlane.xlu0 %220 }
 0x156   :  { %v260_v39 = vsub.f32 %v252_v37, %v256_v36  ;;  %v247_v40 = vmul.f32 0.03125, %v221_v38 }
 0x157   :  { %v237_v41 = vpop.xlane.xlu1 %236 }
 0x158   :  { %v268_v42 = vadd.f32 1e-05, %v260_v39  ;;  %v255_v43 = vmul.f32 %v247_v40, %v247_v40  ;;  %v251_v44 = vmul.f32 0.03125, %v237_v41  ;;  %v263_v0 = vsub.f32 %v3465_v10, %v247_v40 }
 0x159   :  { %v227_v45 = vpop.xlane.xlu0 %226 }
 0x15a   :  { %3270 = vrsqrt.f32 %v268_v42  ;;  %v259_v46 = vsub.f32 %v251_v44, %v255_v43  ;;  %v249_v47 = vmul.f32 0.03125, %v227_v45 }
 0x15b   :  { %v230_v48 = vpop.xlane.xlu1 %229 }
 0x15c   :  { %v267_v49 = vadd.f32 1e-05, %v259_v46  ;;  %v250_v50 = vmul.f32 0.03125, %v230_v48  ;;  %v257_v52 = vmul.f32 %v249_v47, %v249_v47  ;;  %v265_v7 = vsub.f32 %v3480_v19, %v249_v47  ;;  %v414_v48 = vld [vmem:[%s4575_s1 + $0x8] sm:$0xff] }
 0x15d   :  { %v243_v51 = vpop.xlane.xlu0 %242 }
 0x15e   :  { %3272 = vrsqrt.f32 %v267_v49  ;;  %v253_v53 = vmul.f32 0.03125, %v243_v51  ;;  %v258_v55 = vmul.f32 %v250_v50, %v250_v50  ;;  %v266_v13 = vsub.f32 %v3484_v21, %v250_v50  ;;  %v413_v50 = vld [vmem:[%s4575_s1] sm:$0xff] }
 0x15f   :  { %v246_v54 = vpop.xlane.xlu1 %245 }
 0x160   :  { %v261_v56 = vsub.f32 %v253_v53, %v257_v52  ;;  %v254_v57 = vmul.f32 0.03125, %v246_v54  ;;  %v416_v53 = vld [vmem:[%s4575_s1 + $0x18] sm:$0xff] }
 0x162   :  { %v269_v58 = vadd.f32 1e-05, %v261_v56  ;;  %v262_v59 = vsub.f32 %v254_v57, %v258_v55 }
 0x164   :  { %3274 = vrsqrt.f32 %v269_v58  ;;  %v270_v60 = vadd.f32 1e-05, %v262_v59 }
 0x166   :  { %3276 = vrsqrt.f32 %v270_v60  ;;  %v415_v60 = vld [vmem:[%s4575_s1 + $0x10] sm:$0xff] }
 0x167   :  { %v3271_v61 = vpop.eup %3270 }
 0x168   :  { %v276_v63 = vmul.f32 %v3271_v61, %v264_v62  ;;  %v418_v61 = vld [vmem:[%s4575_s1 + $0x28] sm:$0xff] }
 0x16a   :  { %v284_v4 = vmul.f32 %v2770_v1, %v276_v63 }
 0x16b   :  { %v3273_v2 = vpop.eup %3272 }
 0x16c   :  { %v275_v3 = vmul.f32 %v3273_v2, %v263_v0  ;;  %v292_v12 = vadd.f32 %v2771_v5, %v284_v4  ;;  %v420_v4 = vld [vmem:[%s4575_s1 + $0x38] sm:$0xff] }
 0x16e   :  { %v283_v6 = vmul.f32 %v2770_v1, %v275_v3  ;;  %v417_v3 = vld [vmem:[%s4575_s1 + $0x20] sm:$0xff] }
 0x170   :  { %v291_v9 = vadd.f32 %v2771_v5, %v283_v6 }
 0x171   :  { %v3275_v11 = vpop.eup %3274 }
 0x172   :  { %3030 = vmatprep.mubr.msk.f32.mxu1 %vm218_vm1, %v291_v9  ;;  %v277_v14 = vmul.f32 %v3275_v11, %v265_v7 }
 0x173   :  { %v3277_v15 = vpop.eup %3276  ;;  %3031 = vmatmul.mubr.msk.f32.vlgmr.msra.gmra.mxu1 %vm218_vm1, %v292_v12 }
 0x174   :  { %v285_v16 = vmul.f32 %v2770_v1, %v277_v14  ;;  %v278_v17 = vmul.f32 %v3277_v15, %v266_v13  ;;  %v419_v13 = vld [vmem:[%s4575_s1 + $0x30] sm:$0xff] }
 0x176   :  { %v293_v18 = vadd.f32 %v2771_v5, %v285_v16  ;;  %v286_v20 = vmul.f32 %v2770_v1, %v278_v17 }
 0x178   :  { %3033 = vmatprep.mubr.msk.f32.mxu1 %vm218_vm1, %v293_v18  ;;  %v294_v22 = vadd.f32 %v2771_v5, %v286_v20 }
 0x17a   :  { %3034 = vmatmul.mubr.msk.f32.gmra.mxu1 %vm218_vm1, %v294_v22 }
 0x233   :  { %v3032_v23 = vpop.f32.mrf.mxu1 }
 0x234   :  { %v3554_v35 = vadd.f32 %v3032_v23, %v2772_v24 }
 0x235   :  { %v382_v25 = vpop.f32.mrf.mxu1 }
 0x236   :  { %v3542_v26 = vadd.f32 %v2772_v24, %v382_v25 }
 0x238   :  { %3052 = vmatprep.mubr.msk.f32.mxu0 %vm437_vm2, %v3542_v26 }
 0x23a   :  { %v3035_v27 = vpop.f32.mrf.mxu1 }
 0x23b   :  { %v3546_v28 = vadd.f32 %v3035_v27, %v2772_v24 }
 0x23c   :  { %v392_v33 = vpop.f32.mrf.mxu1 }
 0x23d   :  { %v3548_v34 = vadd.f32 %v2772_v24, %v392_v33  ;;  %411 = vrot.lane.b32.xlu0 %v3546_v28, %s3382_s3 }
 0x23f   :  { %409 = vrot.lane.b32.xlu1 %v3548_v34, %s3382_s3 }
 0x243   :  { %405 = vrot.lane.b32.xlu1 %v3554_v35, %s3382_s3 }
 0x247   :  { %403 = vrot.lane.b32.xlu1 %v3542_v26, %s3382_s3 }
 0x2af   :  { %v3560_v36 = vpop.permute.xlu0 %411 }
 0x2b0   :  { %435 = vrot.lane.b32.xlu0 %v3560_v36, %s3383_s17 }
 0x2b1   :  { %v3564_v37 = vpop.permute.xlu1 %409 }
 0x2b2   :  { %433 = vrot.lane.b32.xlu1 %v3564_v37, %s3383_s17 }
 0x2b4   :  { %431 = vrot.lane.b32.xlu0 %v3546_v28, %s3383_s17 }
 0x2b5   :  { %v3570_v38 = vpop.permute.xlu1 %405 }
 0x2b6   :  { %429 = vrot.lane.b32.xlu1 %v3548_v34, %s3383_s17 }
 0x2b8   :  { %427 = vrot.lane.b32.xlu0 %v3570_v38, %s3383_s17 }
 0x2b9   :  { %v3576_v39 = vpop.permute.xlu1 %403 }
 0x2ba   :  { %425 = vrot.lane.b32.xlu1 %v3576_v39, %s3383_s17 }
 0x2bc   :  { %423 = vrot.lane.b32.xlu0 %v3554_v35, %s3383_s17 }
 0x2be   :  { %421 = vrot.lane.b32.xlu1 %v3542_v26, %s3383_s17 }
 0x322   :  { %v436_v40 = vpop.permute.xlu0 %435 }
 0x323   :  { %3036 = vmatprep.subr.msk.mxu0 %vm437_vm2, %v436_v40 }
 0x324   :  { %3037 = vmatpush3.xpose.msk.msra.mxu0 %vm437_vm2, %v436_v40  ;;  %v434_v41 = vpop.permute.xlu1 %433 }
 0x325   :  { %3038 = vmatprep.subr.msk.mxu0 %vm437_vm2, %v434_v41 }
 0x326   :  { %v432_v42 = vpop.permute.xlu0 %431 }
 0x328   :  { %3039 = vmatpush3.xpose.msk.msra.mxu0 %vm437_vm2, %v434_v41  ;;  %v430_v43 = vpop.permute.xlu1 %429 }
 0x329   :  { %3040 = vmatprep.subr.msk.mxu0 %vm437_vm2, %v432_v42 }
 0x32a   :  { %v428_v44 = vpop.permute.xlu0 %427 }
 0x32c   :  { %3041 = vmatpush3.xpose.msk.msra.mxu0 %vm437_vm2, %v432_v42  ;;  %v426_v45 = vpop.permute.xlu1 %425 }
 0x32d   :  { %3042 = vmatprep.subr.msk.mxu0 %vm437_vm2, %v430_v43 }
 0x32e   :  { %v424_v46 = vpop.permute.xlu0 %423 }
 0x330   :  { %3043 = vmatpush3.xpose.msk.msra.mxu0 %vm437_vm2, %v430_v43  ;;  %v422_v47 = vpop.permute.xlu1 %421 }
 0x331   :  { %3044 = vmatprep.subr.msk.mxu0 %vm437_vm2, %v428_v44 }
 0x334   :  { %3045 = vmatpush3.xpose.msk.msra.mxu0 %vm437_vm2, %v428_v44 }
 0x335   :  { %3046 = vmatprep.subr.msk.mxu0 %vm437_vm2, %v426_v45 }
 0x338   :  { %3047 = vmatpush3.xpose.msk.msra.mxu0 %vm437_vm2, %v426_v45 }
 0x339   :  { %3048 = vmatprep.subr.msk.mxu0 %vm437_vm2, %v424_v46 }
 0x33c   :  { %3049 = vmatpush3.xpose.msk.msra.mxu0 %vm437_vm2, %v424_v46 }
 0x33d   :  { %3050 = vmatprep.subr.msk.mxu0 %vm437_vm2, %v422_v47 }
 0x340   :  { %3051 = vmatpush3.xpose.msk.msra.mxu0 %vm437_vm2, %v422_v47 }
 0x343   :  { %3053 = vmatmul.mubr.msk.f32.vlgmr.msra.gmra.mxu0 %vm437_vm2, %v3554_v35 }
 0x344   :  { %3055 = vmatprep.mubr.msk.f32.mxu0 %vm437_vm2, %v3576_v39 }
 0x347   :  { %3056 = vmatmul.mubr.msk.f32.gmra.mxu0 %vm437_vm2, %v3570_v38 }
 0x348   :  { %3058 = vmatprep.mubr.msk.f32.mxu0 %vm437_vm2, %v3548_v34 }
 0x34b   :  { %3059 = vmatmul.mubr.msk.f32.gmra.mxu0 %vm437_vm2, %v3546_v28 }
 0x34c   :  { %3061 = vmatprep.mubr.msk.f32.mxu0 %vm437_vm2, %v3564_v37 }
 0x34f   :  { %3062 = vmatmul.mubr.msk.f32.gmra.mxu0 %vm437_vm2, %v3560_v36 }
 0x403   :  { %v3054_v49 = vpop.f32.mrf.mxu0 }
 0x404   :  { %v542_v51 = vadd.f32 %v3054_v49, %v414_v48 }
 0x405   :  { %v536_v52 = vpop.f32.mrf.mxu0 }
 0x406   :  { %v537_v54 = vadd.f32 %v536_v52, %v413_v50  ;;  %v579_v55 = vsel %vm575_vm3, %v542_v51, -inf }
 0x407   :  { %580 = vmax.xlane.f32.xlu1 %v579_v55  ;;  %v3057_v56 = vpop.f32.mrf.mxu0 }
 0x408   :  { %v552_v57 = vadd.f32 %v3057_v56, %v416_v53  ;;  %v576_v58 = vsel %vm575_vm3, %v537_v54, -inf }
 0x409   :  { %v546_v59 = vpop.f32.mrf.mxu0  ;;  %577 = vmax.xlane.f32.xlu0 %v576_v58 }
 0x40a   :  { %v547_v63 = vadd.f32 %v546_v59, %v415_v60  ;;  %v585_v1 = vsel %vm575_vm3, %v552_v57, -inf }
 0x40b   :  { %v3060_v62 = vpop.f32.mrf.mxu0 }
 0x40c   :  { %v562_v0 = vadd.f32 %v3060_v62, %v418_v61  ;;  %v582_v11 = vsel %vm575_vm3, %v547_v63, -inf }
 0x40d   :  { %v556_v2 = vpop.f32.mrf.mxu0  ;;  %586 = vmax.xlane.f32.xlu0 %v585_v1 }
 0x40e   :  { %v591_v5 = vsel %vm575_vm3, %v562_v0, -inf  ;;  %v557_v7 = vadd.f32 %v556_v2, %v417_v3 }
 0x40f   :  { %592 = vmax.xlane.f32.xlu1 %v591_v5  ;;  %v3063_v6 = vpop.f32.mrf.mxu0 }
 0x410   :  { %v572_v9 = vadd.f32 %v3063_v6, %v420_v4  ;;  %v588_v16 = vsel %vm575_vm3, %v557_v7, -inf }
 0x411   :  { %v566_v12 = vpop.f32.mrf.mxu0  ;;  %583 = vmax.xlane.f32.xlu0 %v582_v11 }
 0x412   :  { %v597_v14 = vsel %vm575_vm3, %v572_v9, -inf  ;;  %v567_v15 = vadd.f32 %v566_v12, %v419_v13 }
 0x413   :  { %598 = vmax.xlane.f32.xlu1 %v597_v14 }
 0x414   :  { %v594_v17 = vsel %vm575_vm3, %v567_v15, -inf }
 0x415   :  { %589 = vmax.xlane.f32.xlu0 %v588_v16 }
 0x419   :  { %595 = vmax.xlane.f32.xlu0 %v594_v17 }
 0x424   :  { %676 = vrot.lane.b32.xlu1 %v3564_v37, %s3384_s11 }
 0x428   :  { %674 = vrot.lane.b32.xlu1 %v3546_v28, %s3384_s11 }
 0x42c   :  { %672 = vrot.lane.b32.xlu1 %v3548_v34, %s3384_s11 }
 0x42f   :  { %678 = vrot.lane.b32.xlu0 %v3560_v36, %s3384_s11 }
 0x430   :  { %668 = vrot.lane.b32.xlu1 %v3576_v39, %s3384_s11 }
 0x433   :  { %670 = vrot.lane.b32.xlu0 %v3570_v38, %s3384_s11 }
 0x490   :  { %v581_v18 = vpop.xlane.xlu1 %580 }
 0x491   :  { %v601_v20 = vsub.f32 %v542_v51, %v581_v18 }
 0x492   :  { %v578_v22 = vpop.xlane.xlu0 %577 }
 0x493   :  { %v610_v23 = vmul.f32 1.442695, %v601_v20  ;;  %v600_v24 = vsub.f32 %v537_v54, %v578_v22 }
 0x495   :  { %3278 = vpow2.f32 %v610_v23  ;;  %v608_v25 = vmul.f32 1.442695, %v600_v24 }
 0x496   :  { %v587_v27 = vpop.xlane.xlu0 %586 }
 0x497   :  { %3280 = vpow2.f32 %v608_v25  ;;  %v603_v28 = vsub.f32 %v552_v57, %v587_v27 }
 0x498   :  { %v593_v33 = vpop.xlane.xlu1 %592 }
 0x499   :  { %v614_v34 = vmul.f32 1.442695, %v603_v28  ;;  %v605_v37 = vsub.f32 %v562_v0, %v593_v33 }
 0x49a   :  { %v584_v36 = vpop.xlane.xlu0 %583 }
 0x49b   :  { %3282 = vpow2.f32 %v614_v34  ;;  %v618_v40 = vmul.f32 1.442695, %v605_v37  ;;  %v602_v39 = vsub.f32 %v547_v63, %v584_v36 }
 0x49c   :  { %v599_v41 = vpop.xlane.xlu1 %598 }
 0x49d   :  { %3284 = vpow2.f32 %v618_v40  ;;  %v612_v38 = vmul.f32 1.442695, %v602_v39  ;;  %v607_v42 = vsub.f32 %v572_v9, %v599_v41 }
 0x49e   :  { %v590_v43 = vpop.xlane.xlu0 %589 }
 0x49f   :  { %3286 = vpow2.f32 %v612_v38  ;;  %v622_v44 = vmul.f32 1.442695, %v607_v42  ;;  %v604_v45 = vsub.f32 %v557_v7, %v590_v43 }
 0x4a0   :  { %v677_v46 = vpop.permute.xlu1 %676 }
 0x4a1   :  { %3288 = vpow2.f32 %v622_v44  ;;  %v616_v47 = vmul.f32 1.442695, %v604_v45 }
 0x4a2   :  { %v3658_v48 = vpop.eup %3278  ;;  %v596_v49 = vpop.xlane.xlu0 %595 }
 0x4a3   :  { %3290 = vpow2.f32 %v616_v47  ;;  %v606_v50 = vsub.f32 %v567_v15, %v596_v49  ;;  %v627_v51 = vsel %vm575_vm3, %v3658_v48, 0.0 }
 0x4a4   :  { %v3281_v52 = vpop.eup %3280  ;;  %628 = vadd.xlane.f32.xlu1 %v627_v51  ;;  %v675_v54 = vpop.permute.xlu1 %674 }
 0x4a5   :  { %v620_v53 = vmul.f32 1.442695, %v606_v50  ;;  %v624_v55 = vsel %vm575_vm3, %v3281_v52, 0.0 }
 0x4a6   :  { %625 = vadd.xlane.f32.xlu0 %v624_v55  ;;  %v679_v56 = vpop.permute.xlu0 %678 }
 0x4a7   :  { %3292 = vpow2.f32 %v620_v53  ;;  %3064 = vmatprep.subr.mxu1 %v679_v56 }
 0x4a8   :  { %v3663_v57 = vpop.eup %3282  ;;  %3065 = vmatpush3.msra.mxu1 %v679_v56  ;;  %v673_v60 = vpop.permute.xlu1 %672 }
 0x4a9   :  { %3066 = vmatprep.subr.mxu1 %v677_v46  ;;  %v633_v58 = vsel %vm575_vm3, %v3663_v57, 0.0 }
 0x4aa   :  { %v3667_v59 = vpop.eup %3284  ;;  %634 = vadd.xlane.f32.xlu1 %v633_v58  ;;  %3067 = vmatpush3.msra.mxu1 %v677_v46  ;;  %v671_v1 = vpop.permute.xlu0 %670 }
 0x4ab   :  { %3068 = vmatprep.subr.mxu1 %v675_v54  ;;  %v639_v62 = vsel %vm575_vm3, %v3667_v59, 0.0 }
 0x4ac   :  { %v3287_v61 = vpop.eup %3286  ;;  %3069 = vmatpush3.msra.mxu1 %v675_v54  ;;  %v669_v3 = vpop.permute.xlu1 %668 }
 0x4ad   :  { %3070 = vmatprep.subr.mxu1 %v673_v60  ;;  %v630_v63 = vsel %vm575_vm3, %v3287_v61, 0.0 }
 0x4ae   :  { %v3672_v0 = vpop.eup %3288  ;;  %640 = vadd.xlane.f32.xlu1 %v639_v62  ;;  %631 = vadd.xlane.f32.xlu0 %v630_v63 }
 0x4af   :  { %3071 = vmatpush3.msra.mxu1 %v673_v60  ;;  %v645_v4 = vsel %vm575_vm3, %v3672_v0, 0.0 }
 0x4b0   :  { %v3291_v2 = vpop.eup %3290  ;;  %3072 = vmatprep.subr.mxu1 %v671_v1 }
 0x4b1   :  { %3073 = vmatpush3.msra.mxu1 %v671_v1  ;;  %v636_v5 = vsel %vm575_vm3, %v3291_v2, 0.0 }
 0x4b2   :  { %3074 = vmatprep.subr.mxu1 %v669_v3  ;;  %646 = vadd.xlane.f32.xlu1 %v645_v4 }
 0x4b3   :  { %637 = vadd.xlane.f32.xlu0 %v636_v5  ;;  %3075 = vmatpush3.msra.mxu1 %v669_v3 }
 0x4b4   :  { %v3293_v6 = vpop.eup %3292 }
 0x4b5   :  { %v642_v7 = vsel %vm575_vm3, %v3293_v6, 0.0 }
 0x4b7   :  { %643 = vadd.xlane.f32.xlu0 %v642_v7 }
 0x4c3   :  { %664 = vrot.lane.b32.xlu1 %v3542_v26, %s3384_s11 }
 0x4c7   :  { %845 = vrot.lane.b32.xlu1 %v3505_v30, %s3385_s12 }
 0x4cd   :  { %666 = vrot.lane.b32.xlu0 %v3554_v35, %s3384_s11 }
 0x4d1   :  { %847 = vrot.lane.b32.xlu0 %v3500_v29, %s3385_s12 }
 0x4d5   :  { %843 = vrot.lane.b32.xlu0 %v3512_v31, %s3385_s12 }
 0x4d9   :  { %841 = vrot.lane.b32.xlu0 %v3519_v32, %s3385_s12 }
 0x52d   :  { %v629_v11 = vpop.xlane.xlu1 %628 }
 0x52f   :  { %v626_v9 = vpop.xlane.xlu0 %625 }
 0x530   :  { %3294 = vrcp.f32 %v626_v9 }
 0x531   :  { %3296 = vrcp.f32 %v629_v11 }
 0x533   :  { %v635_v26 = vpop.xlane.xlu1 %634 }
 0x537   :  { %v632_v12 = vpop.xlane.xlu0 %631  ;;  %v641_v35 = vpop.xlane.xlu1 %640 }
 0x538   :  { %3298 = vrcp.f32 %v632_v12 }
 0x539   :  { %3300 = vrcp.f32 %v635_v26 }
 0x53b   :  { %v647_v30 = vpop.xlane.xlu1 %646 }
 0x53c   :  { %v638_v13 = vpop.xlane.xlu0 %637 }
 0x53d   :  { %v3295_v29 = vpop.eup %3294  ;;  %3302 = vrcp.f32 %v638_v13 }
 0x53e   :  { %v656_v14 = vmul.f32 %v3295_v29, %v3281_v52  ;;  %3304 = vrcp.f32 %v641_v35  ;;  %v3297_v31 = vpop.eup %3296 }
 0x53f   :  { %v665_v17 = vpop.permute.xlu1 %664  ;;  %v657_v18 = vmul.f32 %v3297_v31, %v3658_v48  ;;  %v1050_v31 = vld [vmem:[%s4576_s5 + $0x48] sm:$0xff] }
 0x540   :  { %v644_v15 = vpop.xlane.xlu0 %643  ;;  %3080 = vmatprep.mubr.msk.f32.mxu1 %vm575_vm3, %v656_v14  ;;  %v3387_v14 = vmov 0.0  }
 0x541   :  { %3306 = vrcp.f32 %v644_v15  ;;  %v1051_v15 = vld [vmem:[%s4576_s5 + $0x50] sm:$0xff] }
 0x542   :  { %3308 = vrcp.f32 %v647_v30  ;;  %v1052_v30 = vld [vmem:[%s4576_s5 + $0x58] sm:$0xff] }
 0x543   :  { %v846_v39 = vpop.permute.xlu1 %845  ;;  %3106 = vmatprep.subr.mxu0 %v1052_v30 }
 0x544   :  { %v667_v32 = vpop.permute.xlu0 %666  ;;  %3107 = vmatpush3.msra.mxu0 %v1052_v30 }
 0x545   :  { %3076 = vmatprep.subr.mxu1 %v667_v32  ;;  %v3299_v16 = vpop.eup %3298  ;;  %3108 = vmatprep.subr.mxu0 %v1051_v15 }
 0x546   :  { %3077 = vmatpush3.msra.mxu1 %v667_v32  ;;  %v658_v20 = vmul.f32 %v3299_v16, %v3287_v61  ;;  %v3301_v22 = vpop.eup %3300  ;;  %3109 = vmatpush3.msra.mxu0 %v1051_v15  ;;  %v1049_v32 = vld [vmem:[%s4576_s5 + $0x40] sm:$0xff]  ;;  %v1048_v16 = vld [vmem:[%s4576_s5 + $0x38] sm:$0xff] }
 0x547   :  { %3078 = vmatprep.subr.mxu1 %v665_v17  ;;  %v659_v24 = vmul.f32 %v3301_v22, %v3663_v57  ;;  %3110 = vmatprep.subr.mxu0 %v1050_v31 }
 0x548   :  { %3079 = vmatpush3.msra.mxu1 %v665_v17  ;;  %v848_v40 = vpop.permute.xlu0 %847  ;;  %3111 = vmatpush3.msra.mxu0 %v1050_v31  ;;  %v1047_v17 = vld [vmem:[%s4576_s5 + $0x30] sm:$0xff] }
 0x549   :  { %3081 = vmatmul.mubr.msk.f32.vlgmr.msra.gmra.mxu1 %vm575_vm3, %v657_v18  ;;  %3092 = vmatprep.subr.mxu1 %v848_v40  ;;  %v1046_v18 = vld [vmem:[%s4576_s5 + $0x28] sm:$0xff] }
 0x54a   :  { %v3303_v23 = vpop.eup %3302  ;;  %3083 = vmatprep.mubr.msk.f32.mxu1 %vm575_vm3, %v658_v20  ;;  %3093 = vmatpush3.msra.mxu1 %v848_v40 }
 0x54b   :  { %v660_v25 = vmul.f32 %v3303_v23, %v3291_v2  ;;  %v3305_v27 = vpop.eup %3304  ;;  %3094 = vmatprep.subr.mxu1 %v846_v39  ;;  %3112 = vmatprep.subr.mxu0 %v1049_v32 }
 0x54c   :  { %v661_v33 = vmul.f32 %v3305_v27, %v3667_v59  ;;  %3095 = vmatpush3.msra.mxu1 %v846_v39  ;;  %v844_v41 = vpop.permute.xlu0 %843  ;;  %v2805_v59 = vld [vmem:[%s4574_s7 + $0x5] ss:$0 sm:$0xff]  ;;  %3113 = vmatpush3.msra.mxu0 %v1049_v32 }
 0x54d   :  { %3084 = vmatmul.mubr.msk.f32.gmra.mxu1 %vm575_vm3, %v659_v24  ;;  %3096 = vmatprep.subr.mxu1 %v844_v41 }
 0x54e   :  { %v3307_v28 = vpop.eup %3306  ;;  %3086 = vmatprep.mubr.msk.f32.mxu1 %vm575_vm3, %v660_v25  ;;  %3097 = vmatpush3.msra.mxu1 %v844_v41 }
 0x54f   :  { %v662_v34 = vmul.f32 %v3307_v28, %v3293_v6  ;;  %v3309_v37 = vpop.eup %3308  ;;  %3114 = vmatprep.subr.mxu0 %v1048_v16 }
 0x550   :  { %v663_v36 = vmul.f32 %v3309_v37, %v3672_v0  ;;  %v842_v38 = vpop.permute.xlu0 %841  ;;  %3115 = vmatpush3.msra.mxu0 %v1048_v16 }
 0x551   :  { %3087 = vmatmul.mubr.msk.f32.gmra.mxu1 %vm575_vm3, %v661_v33  ;;  %3098 = vmatprep.subr.mxu1 %v842_v38 }
 0x552   :  { %3089 = vmatprep.mubr.msk.f32.mxu1 %vm575_vm3, %v662_v34  ;;  %3099 = vmatpush3.msra.mxu1 %v842_v38 }
 0x553   :  { %1311 = vmatprep.subr.mxu1 %v3387_v14  ;;  %3116 = vmatprep.subr.mxu0 %v1047_v17 }
 0x554   :  { %3117 = vmatpush3.msra.mxu0 %v1047_v17 }
 0x555   :  { %3090 = vmatmul.mubr.msk.f32.gmra.mxu1 %vm575_vm3, %v663_v36  ;;  %3118 = vmatprep.subr.mxu0 %v1046_v18 }
 0x556   :  { %3119 = vmatpush3.msra.mxu0 %v1046_v18 }
 0x609   :  { %v3082_v42 = vpop.f32.mrf.mxu1 }
 0x60b   :  { %v778_v43 = vpop.f32.mrf.mxu1 }
 0x60d   :  { %v3085_v44 = vpop.f32.mrf.mxu1 }
 0x60f   :  { %v788_v45 = vpop.f32.mrf.mxu1 }
 0x610   :  { %819 = vrot.lane.b32.xlu1 %v788_v45, %s3386_s13 }
 0x611   :  { %v3088_v46 = vpop.f32.mrf.mxu1 }
 0x613   :  { %v798_v47 = vpop.f32.mrf.mxu1 }
 0x614   :  { %821 = vrot.lane.b32.xlu1 %v3085_v44, %s3386_s13 }
 0x615   :  { %v3091_v48 = vpop.f32.mrf.mxu1 }
 0x617   :  { %v808_v49 = vpop.f32.mrf.mxu1 }
 0x618   :  { %831 = vrot.lane.b32.xlu1 %v3091_v48, %s3386_s13  ;;  %829 = vrot.lane.b32.xlu0 %v808_v49, %s3386_s13 }
 0x682   :  { %v820_v50 = vpop.permute.xlu1 %819 }
 0x683   :  { %v825_v51 = vsel %vm437_vm2, %v778_v43, %v820_v50 }
 0x684   :  { %3100 = vmatprep.mubr.msk.f32.mxu1 %vm218_vm1, %v825_v51 }
 0x686   :  { %v822_v52 = vpop.permute.xlu1 %821 }
 0x687   :  { %v826_v53 = vsel %vm437_vm2, %v3082_v42, %v822_v52 }
 0x688   :  { %3101 = vmatmul.mubr.msk.f32.vlgmr.msra.gmra.mxu1 %vm218_vm1, %v826_v53  ;;  %v139_v53 = vlaneseq }
 0x68a   :  { %v832_v54 = vpop.permute.xlu1 %831  ;;  %v830_v55 = vpop.permute.xlu0 %829 }
 0x68b   :  { %v836_v56 = vsel %vm437_vm2, %v3088_v46, %v832_v54  ;;  %v835_v57 = vsel %vm437_vm2, %v798_v47, %v830_v55  ;;  %v1045_v55 = vld [vmem:[%s4576_s5 + $0x20] sm:$0xff] }
 0x68c   :  { %3103 = vmatprep.mubr.msk.f32.mxu1 %vm218_vm1, %v835_v57  ;;  %3120 = vmatprep.subr.mxu0 %v1045_v55  ;;  %v3774_v57 = vshrl.u32 %v139_v53, 7 }
 0x68d   :  { %3104 = vmatmul.mubr.msk.f32.gmra.mxu1 %vm218_vm1, %v836_v56  ;;  %3121 = vmatpush3.msra.mxu0 %v1045_v55 }
 0x68e   :  { %vm1071_vm4 = vcmp.lt.s32.totalorder %v3774_v57, 7  ;;  %v143_v32 = vadd.s32 24, %v3774_v57  ;;  %vm1058_vm6 = vcmp.lt.s32.totalorder %v3774_v57, 1 }
 0x748   :  { %v3102_v58 = vpop.f32.mrf.mxu1 }
 0x749   :  { %v951_v60 = vadd.f32 %v3102_v58, %v3463_v8  ;;  %v1044_v58 = vld [vmem:[%s4576_s5 + $0x18] sm:$0xff] }
 0x74a   :  { %v931_v61 = vpop.f32.mrf.mxu1  ;;  %3122 = vmatprep.subr.mxu0 %v1044_v58 }
 0x74b   :  { %v3718_v62 = vadd.f32 %v2805_v59, %v951_v60  ;;  %v950_v63 = vadd.f32 %v931_v61, %v3465_v10  ;;  %3123 = vmatpush3.msra.mxu0 %v1044_v58 }
 0x74d   :  { %v3721_v0 = vadd.f32 %v2805_v59, %v950_v63  ;;  %v3105_v1 = vpop.f32.mrf.mxu1  ;;  %v968_v2 = vsel %vm218_vm1, %v3718_v62, 0.0  ;;  %v978_v6 = vmul.f32 %v3718_v62, %v3718_v62  ;;  %v2806_v63 = vld [vmem:[%s4574_s7 + $0x2] ss:$0 sm:$0xff] }
 0x74e   :  { %969 = vadd.xlane.f32.xlu0 %v968_v2  ;;  %v953_v4 = vadd.f32 %v3105_v1, %v3484_v21  ;;  %v141_v1 = vadd.s32 8, %v3774_v57  ;;  %v1042_v2 = vld [vmem:[%s4576_s5 + $0x8] sm:$0xff] }
 0x74f   :  { %v941_v3 = vpop.f32.mrf.mxu1  ;;  %v965_v8 = vsel %vm218_vm1, %v3721_v0, 0.0  ;;  %v977_v11 = vmul.f32 %v3721_v0, %v3721_v0 }
 0x750   :  { %v952_v5 = vadd.f32 %v941_v3, %v3480_v19  ;;  %v3733_v10 = vadd.f32 %v2805_v59, %v953_v4  ;;  %v984_v19 = vsel %vm218_vm1, %v978_v6, 0.0  ;;  %v1041_v4 = vld [vmem:[%s4576_s5] sm:$0xff] }
 0x751   :  { %v981_v26 = vsel %vm218_vm1, %v977_v11, 0.0 }
 0x752   :  { %v3731_v7 = vadd.f32 %v2805_v59, %v952_v5  ;;  %966 = vadd.xlane.f32.xlu0 %v965_v8  ;;  %v980_v12 = vmul.f32 %v3733_v10, %v3733_v10  ;;  %v974_v29 = vsel %vm218_vm1, %v3733_v10, 0.0  ;;  %v1043_v59 = vld [vmem:[%s4576_s5 + $0x10] sm:$0xff]  ;;  %v2807_v8 = vld [vmem:[%s4574_s7 + $0x3] ss:$0 sm:$0xff] }
 0x753   :  { %3124 = vmatprep.subr.mxu0 %v1043_v59 }
 0x754   :  { %v971_v9 = vsel %vm218_vm1, %v3731_v7, 0.0  ;;  %v979_v21 = vmul.f32 %v3731_v7, %v3731_v7  ;;  %v990_v13 = vsel %vm218_vm1, %v980_v12, 0.0  ;;  %3125 = vmatpush3.msra.mxu0 %v1043_v59 }
 0x755   :  { %972 = vadd.xlane.f32.xlu1 %v971_v9  ;;  %3126 = vmatprep.subr.mxu0 %v1042_v2 }
 0x756   :  { %985 = vadd.xlane.f32.xlu0 %v984_v19  ;;  %v987_v35 = vsel %vm218_vm1, %v979_v21, 0.0  ;;  %3127 = vmatpush3.msra.mxu0 %v1042_v2 }
 0x757   :  { %3128 = vmatprep.subr.mxu0 %v1041_v4 }
 0x758   :  { %3129 = vmatpush3.msra.mxu0 %v1041_v4 }
 0x759   :  { %982 = vadd.xlane.f32.xlu1 %v981_v26  ;;  %v155_v26 = vand.u32 15, %v141_v1 }
 0x75a   :  { %988 = vadd.xlane.f32.xlu0 %v987_v35 }
 0x75b   :  { %vm205_vm5 = vcmp.lt.s32.totalorder %v155_v26, 15  ;;  %v1240_v26 = vld [vmem:[%s4577_s6 + $0x70] sm:$0xff] }
 0x75d   :  { %991 = vadd.xlane.f32.xlu1 %v990_v13 }
 0x75e   :  { %975 = vadd.xlane.f32.xlu0 %v974_v29 }
 0x7d7   :  { %v970_v20 = vpop.xlane.xlu0 %969 }
 0x7d8   :  { %v994_v23 = vmul.f32 0.03125, %v970_v20 }
 0x7da   :  { %v1002_v28 = vmul.f32 %v994_v23, %v994_v23  ;;  %v1010_v60 = vsub.f32 %v3718_v62, %v994_v23 }
 0x7db   :  { %v967_v22 = vpop.xlane.xlu0 %966 }
 0x7dc   :  { %v993_v25 = vmul.f32 0.03125, %v967_v22 }
 0x7de   :  { %v973_v24 = vpop.xlane.xlu1 %972  ;;  %v1001_v40 = vmul.f32 %v993_v25, %v993_v25  ;;  %v1009_v5 = vsub.f32 %v3721_v0, %v993_v25 }
 0x7df   :  { %v986_v27 = vpop.xlane.xlu0 %985  ;;  %v995_v33 = vmul.f32 0.03125, %v973_v24 }
 0x7e0   :  { %v998_v34 = vmul.f32 0.03125, %v986_v27  ;;  %v3805_v27 = vsel %vm205_vm5, 1.0, %v3387_v14 }
 0x7e1   :  { %v1003_v38 = vmul.f32 %v995_v33, %v995_v33  ;;  %v1011_v9 = vsub.f32 %v3731_v7, %v995_v33 }
 0x7e2   :  { %v1006_v37 = vsub.f32 %v998_v34, %v1002_v28  ;;  %v983_v36 = vpop.xlane.xlu1 %982 }
 0x7e3   :  { %v997_v39 = vmul.f32 0.03125, %v983_v36  ;;  %v989_v41 = vpop.xlane.xlu0 %988  ;;  %v169_v36 = vand.u32 15, %v143_v32  ;;  %v1232_v32 = vld [vmem:[%s4577_s6 + $0x30] sm:$0xff] }
 0x7e4   :  { %v1014_v42 = vadd.f32 1e-05, %v1006_v37  ;;  %v999_v43 = vmul.f32 0.03125, %v989_v41 }
 0x7e5   :  { %v1005_v44 = vsub.f32 %v997_v39, %v1001_v40  ;;  %vm207_vm7 = vcmp.lt.s32.totalorder %v169_v36, 15  ;;  %v1243_v36 = vld [vmem:[%s4577_s6 + $0x88] sm:$0xff] }
 0x7e6   :  { %3310 = vrsqrt.f32 %v1014_v42  ;;  %v1007_v45 = vsub.f32 %v999_v43, %v1003_v38  ;;  %v992_v47 = vpop.xlane.xlu1 %991 }
 0x7e7   :  { %v1013_v46 = vadd.f32 1e-05, %v1005_v44  ;;  %v976_v48 = vpop.xlane.xlu0 %975  ;;  %v1000_v51 = vmul.f32 0.03125, %v992_v47 }
 0x7e8   :  { %v1015_v49 = vadd.f32 1e-05, %v1007_v45  ;;  %v996_v50 = vmul.f32 0.03125, %v976_v48 }
 0x7e9   :  { %3312 = vrsqrt.f32 %v1013_v46  ;;  %v3827_v46 = vsel %vm207_vm7, 1.0, %v3387_v14 }
 0x7ea   :  { %3314 = vrsqrt.f32 %v1015_v49  ;;  %v1004_v52 = vmul.f32 %v996_v50, %v996_v50  ;;  %v1012_v15 = vsub.f32 %v3733_v10, %v996_v50  ;;  %v148_v49 = vand.u32 15, %v3774_v57 }
 0x7eb   :  { %v142_v50 = vadd.s32 16, %v3774_v57 }
 0x7ec   :  { %v1008_v54 = vsub.f32 %v1000_v51, %v1004_v52  ;;  %vm192_vm8 = vcmp.gt.s32.totalorder %v148_v49, 0 }
 0x7ed   :  { %v3837_v51 = vsel %vm192_vm8, 1.0, %v3387_v14  ;;  %v162_v52 = vand.u32 15, %v142_v50 }
 0x7ee   :  { %v1016_v56 = vadd.f32 1e-05, %v1008_v54 }
 0x7ef   :  { %vm194_vm9 = vcmp.gt.s32.totalorder %v162_v52, 0 }
 0x7f0   :  { %3316 = vrsqrt.f32 %v1016_v56 }
 0x7f3   :  { %v3311_v61 = vpop.eup %3310 }
 0x7f4   :  { %v1022_v3 = vmul.f32 %v3311_v61, %v1010_v60  ;;  %v3843_v60 = vsel %vm194_vm9, 1.0, %v3387_v14 }
 0x7f6   :  { %v3313_v6 = vpop.eup %3312  ;;  %v1030_v11 = vmul.f32 %v2806_v63, %v1022_v3 }
 0x7f7   :  { %v3315_v19 = vpop.eup %3314  ;;  %v1021_v21 = vmul.f32 %v3313_v6, %v1009_v5 }
 0x7f8   :  { %v1038_v12 = vadd.f32 %v2807_v8, %v1030_v11  ;;  %v1023_v35 = vmul.f32 %v3315_v19, %v1011_v9 }
 0x7f9   :  { %v1029_v13 = vmul.f32 %v2806_v63, %v1021_v21  ;;  %v1241_v21 = vld [vmem:[%s4577_s6 + $0x78] sm:$0xff] }
 0x7fa   :  { %1086 = vrot.lane.b32.xlu1 %v1038_v12, %s3385_s12  ;;  %v1031_v29 = vmul.f32 %v2806_v63, %v1023_v35  ;;  %v1068_v18 = vrot.slane %v1038_v12, 1  ;;  %v1055_v22 = vrot.slane %v1038_v12, 7  ;;  %1312 = vmatpush1.msra.mxu1 %v1241_v21  ;;  %v1239_v12 = vld [vmem:[%s4577_s6 + $0x68] sm:$0xff]  ;;  %v1238_v35 = vld [vmem:[%s4577_s6 + $0x60] sm:$0xff] }
 0x7fb   :  { %v1037_v30 = vadd.f32 %v2807_v8, %v1029_v13  ;;  %1313 = vmatprep.subr.mxu1 %v3387_v14  ;;  %v1237_v13 = vld [vmem:[%s4577_s6 + $0x58] sm:$0xff] }
 0x7fc   :  { %v1039_v31 = vadd.f32 %v2807_v8, %v1031_v29  ;;  %1314 = vmatpush1.msra.mxu1 %v1240_v26  ;;  %v1236_v29 = vld [vmem:[%s4577_s6 + $0x50] sm:$0xff] }
 0x7fd   :  { %v3317_v16 = vpop.eup %3316  ;;  %1084 = vrot.lane.b32.xlu0 %v1037_v30, %s3385_s12  ;;  %v1067_v17 = vrot.slane %v1037_v30, 1  ;;  %v1054_v20 = vrot.slane %v1037_v30, 7  ;;  %1315 = vmatprep.subr.mxu1 %v3387_v14  ;;  %v1235_v30 = vld [vmem:[%s4577_s6 + $0x48] sm:$0xff] }
 0x7fe   :  { %v1024_v23 = vmul.f32 %v3317_v16, %v1012_v15  ;;  %v1056_v24 = vrot.slane %v1039_v31, 7  ;;  %v1069_v25 = vrot.slane %v1039_v31, 1  ;;  %1316 = vmatpush1.msra.mxu1 %v1239_v12  ;;  %v1234_v15 = vld [vmem:[%s4577_s6 + $0x40] sm:$0xff]  ;;  %v1231_v16 = vld [vmem:[%s4577_s6 + $0x28] sm:$0xff] }
 0x7ff   :  { %v1074_v28 = vsel %vm1071_vm4, %v1067_v17, %v1068_v18  ;;  %v1061_v33 = vsel %vm1058_vm6, %v1054_v20, %v1055_v22  ;;  %1317 = vmatprep.subr.mxu1 %v3387_v14 }
 0x800   :  { %v1032_v34 = vmul.f32 %v2806_v63, %v1024_v23  ;;  %1100 = vrot.lane.b32.xlu1 %v1074_v28, %s3384_s11  ;;  %v1073_v37 = vsel %vm1071_vm4, %v1068_v18, %v1069_v25  ;;  %v1060_v40 = vsel %vm1058_vm6, %v1055_v22, %v1056_v24  ;;  %1318 = vmatpush1.msra.mxu1 %v1238_v35  ;;  %v1229_v18 = vld [vmem:[%s4577_s6 + $0x18] sm:$0xff]  ;;  %v1227_v22 = vld [vmem:[%s4577_s6 + $0x8] sm:$0xff]  ;;  %v1226_v23 = vld [vmem:[%s4577_s6] sm:$0xff] }
 0x801   :  { %1088 = vrot.lane.b32.xlu0 %v1039_v31, %s3385_s12  ;;  %v1077_v39 = vmul.f32 %v3805_v27, %v1073_v37  ;;  %v1065_v2 = vmul.f32 %v3843_v60, %v1060_v40  ;;  %1319 = vmatprep.subr.mxu1 %v3387_v14  ;;  %v1233_v31 = vld [vmem:[%s4577_s6 + $0x38] sm:$0xff]  ;;  %v1247_v28 = vld [vmem:[%s4577_s6 + $0xa8] sm:$0xff]  ;;  %v1244_v37 = vld [vmem:[%s4577_s6 + $0x90] sm:$0xff] }
 0x802   :  { %v1040_v41 = vadd.f32 %v2807_v8, %v1032_v34  ;;  %1320 = vmatpush1.msra.mxu1 %v1237_v13  ;;  %v1245_v34 = vld [vmem:[%s4577_s6 + $0x98] sm:$0xff]  ;;  %v1242_v40 = vld [vmem:[%s4577_s6 + $0x80] sm:$0xff] }
 0x803   :  { %1321 = vmatprep.subr.mxu1 %v3387_v14 }
 0x804   :  { %1102 = vrot.lane.b32.xlu1 %v1077_v39, %s3384_s11  ;;  %v1070_v38 = vrot.slane %v1040_v41, 1  ;;  %v1057_v42 = vrot.slane %v1040_v41, 7  ;;  %1322 = vmatpush1.msra.mxu1 %v1236_v29  ;;  %v2808_v39 = vld [vmem:[%s4574_s7 + $0x6] ss:$0 sm:$0xff] }
 0x805   :  { %1323 = vmatprep.subr.mxu1 %v3387_v14 }
 0x806   :  { %v1072_v43 = vsel %vm1071_vm4, %v1069_v25, %v1070_v38  ;;  %v1062_v44 = vsel %vm1058_vm6, %v1057_v42, %v1054_v20  ;;  %v1059_v45 = vsel %vm1058_vm6, %v1056_v24, %v1057_v42  ;;  %v1075_v47 = vsel %vm1071_vm4, %v1070_v38, %v1067_v17  ;;  %1324 = vmatpush1.msra.mxu1 %v1235_v30  ;;  %v1230_v17 = vld [vmem:[%s4577_s6 + $0x20] sm:$0xff]  ;;  %v1228_v20 = vld [vmem:[%s4577_s6 + $0x10] sm:$0xff]  ;;  %v1249_v24 = vld [vmem:[%s4577_s6 + $0xb8] sm:$0xff] }
 0x807   :  { %1104 = vrot.lane.b32.xlu0 %v1072_v43, %s3384_s11  ;;  %v1079_v48 = vmul.f32 %v3827_v46, %v1075_v47  ;;  %v1063_v55 = vmul.f32 %v3837_v51, %v1062_v44  ;;  %1325 = vmatprep.subr.mxu1 %v3387_v14  ;;  %v1248_v25 = vld [vmem:[%s4577_s6 + $0xb0] sm:$0xff] }
 0x808   :  { %1090 = vrot.lane.b32.xlu1 %v1040_v41, %s3385_s12  ;;  %1326 = vmatpush1.msra.mxu1 %v1234_v15 }
 0x809   :  { %1327 = vmatprep.subr.mxu1 %v3387_v14 }
 0x80a   :  { %1328 = vmatpush1.msra.mxu1 %v1233_v31 }
 0x80b   :  { %1329 = vmatprep.subr.mxu1 %v3387_v14 }
 0x80c   :  { %1106 = vrot.lane.b32.xlu1 %v1079_v48, %s3384_s11  ;;  %1330 = vmatpush1.msra.mxu1 %v1232_v32 }
 0x80d   :  { %1331 = vmatprep.subr.mxu1 %v3387_v14 }
 0x80e   :  { %1332 = vmatpush1.msra.mxu1 %v1231_v16 }
 0x80f   :  { %1333 = vmatprep.subr.mxu1 %v3387_v14 }
 0x810   :  { %1334 = vmatpush1.msra.mxu1 %v1230_v17  ;;  %v2813_v17 = vld [vmem:[%s4574_s7 + $0x7] ss:$0 sm:$0xff] }
 0x811   :  { %1335 = vmatprep.subr.mxu1 %v3387_v14 }
 0x812   :  { %1336 = vmatpush1.msra.mxu1 %v1229_v18 }
 0x813   :  { %1337 = vmatprep.subr.mxu1 %v3387_v14 }
 0x814   :  { %1338 = vmatpush1.msra.mxu1 %v1228_v20 }
 0x815   :  { %1339 = vmatprep.subr.mxu1 %v3387_v14 }
 0x816   :  { %1340 = vmatpush1.msra.mxu1 %v1227_v22 }
 0x817   :  { %1341 = vmatprep.subr.mxu1 %v3387_v14 }
 0x818   :  { %1342 = vmatpush1.msra.mxu1 %v1226_v23 }
 0x819   :  { %1359 = vmatprep.subr.mxu1 %v3387_v14 }
 0x81a   :  { %1360 = vmatpush2.msra.mxu1 %v1249_v24 }
 0x81b   :  { %1361 = vmatprep.subr.mxu1 %v3387_v14 }
 0x81c   :  { %1362 = vmatpush2.msra.mxu1 %v1248_v25 }
 0x81d   :  { %1363 = vmatprep.subr.mxu1 %v3387_v14 }
 0x81e   :  { %1364 = vmatpush2.msra.mxu1 %v1247_v28 }
 0x81f   :  { %1365 = vmatprep.subr.mxu1 %v3387_v14 }
 0x86c   :  { %v1087_v53 = vpop.permute.xlu1 %1086 }
 0x86d   :  { %v1113_v63 = vsel %vm218_vm1, %v1061_v33, %v1087_v53  ;;  %v1246_v33 = vld [vmem:[%s4577_s6 + $0xa0] sm:$0xff] }
 0x86e   :  { %1366 = vmatpush2.msra.mxu1 %v1246_v33 }
 0x86f   :  { %v1085_v54 = vpop.permute.xlu0 %1084  ;;  %1367 = vmatprep.subr.mxu1 %v3387_v14 }
 0x870   :  { %v1112_v56 = vsel %vm218_vm1, %v1063_v55, %v1085_v54  ;;  %1368 = vmatpush2.msra.mxu1 %v1245_v34 }
 0x871   :  { %1369 = vmatprep.subr.mxu1 %v3387_v14 }
 0x872   :  { %v1101_v58 = vpop.permute.xlu1 %1100  ;;  %1370 = vmatpush2.msra.mxu1 %v1244_v37 }
 0x873   :  { %v1116_v59 = vsel %vm575_vm3, %v1112_v56, %v1101_v58  ;;  %v1089_v61 = vpop.permute.xlu0 %1088  ;;  %1371 = vmatprep.subr.mxu1 %v3387_v14 }
 0x874   :  { %3130 = vmatprep.mubr.msk.f32.mxu0 %vm1124_vm10, %v1116_v59  ;;  %v1114_v4 = vsel %vm218_vm1, %v1065_v2, %v1089_v61  ;;  %1372 = vmatpush2.msra.mxu1 %v1243_v36 }
 0x875   :  { %1373 = vmatprep.subr.mxu1 %v3387_v14 }
 0x876   :  { %v1103_v1 = vpop.permute.xlu1 %1102  ;;  %1374 = vmatpush2.msra.mxu1 %v1242_v40 }
 0x877   :  { %v1117_v3 = vsel %vm575_vm3, %v1113_v63, %v1103_v1 }
 0x878   :  { %3131 = vmatmul.mubr.msk.f32.vlgmr.msra.gmra.mxu0 %vm1124_vm10, %v1117_v3 }
 0x879   :  { %v1105_v5 = vpop.permute.xlu0 %1104 }
 0x87a   :  { %v1118_v8 = vsel %vm575_vm3, %v1114_v4, %v1105_v5  ;;  %v1091_v6 = vpop.permute.xlu1 %1090 }
 0x87b   :  { %3133 = vmatprep.mubr.msk.f32.mxu0 %vm1124_vm10, %v1118_v8  ;;  %v1115_v9 = vsel %vm218_vm1, %v1059_v45, %v1091_v6 }
 0x87e   :  { %v1107_v11 = vpop.permute.xlu1 %1106 }
 0x87f   :  { %v1119_v19 = vsel %vm575_vm3, %v1115_v9, %v1107_v11 }
 0x880   :  { %3134 = vmatmul.mubr.msk.f32.gmra.mxu0 %vm1124_vm10, %v1119_v19 }
 0x938   :  { %v3132_v41 = vpop.f32.mrf.mxu0 }
 0x939   :  { %v1209_v38 = vadd.f32 %v3132_v41, %v2808_v39 }
 0x93a   :  { %v1203_v42 = vpop.f32.mrf.mxu0 }
 0x93b   :  { %v1223_v43 = vmax.f32 %v1209_v38, 0.0  ;;  %v1204_v44 = vadd.f32 %v2808_v39, %v1203_v42 }
 0x93d   :  { %v1222_v45 = vmax.f32 %v1204_v44, 0.0  ;;  %1281 = vrot.lane.b32.xlu1 %v1223_v43, %s3384_s11  ;;  %v1252_v47 = vrot.slane %v1223_v43, 7  ;;  %v1264_v48 = vrot.slane %v1223_v43, 1 }
 0x93f   :  { %v1251_v49 = vrot.slane %v1222_v45, 7  ;;  %v1263_v50 = vrot.slane %v1222_v45, 1  ;;  %1279 = vrot.lane.b32.xlu0 %v1222_v45, %s3384_s11 }
 0x940   :  { %v3135_v52 = vpop.f32.mrf.mxu0 }
 0x941   :  { %v1219_v53 = vadd.f32 %v3135_v52, %v2808_v39  ;;  %v1269_v54 = vsel %vm1071_vm4, %v1263_v50, %v1264_v48  ;;  %v1257_v55 = vsel %vm1058_vm6, %v1251_v49, %v1252_v47 }
 0x942   :  { %v1213_v56 = vpop.f32.mrf.mxu0  ;;  %2814 = vmatprep.mubr.msk.f32.mxu1 %vm575_vm3, %v1269_v54  ;;  %v4031_v54 = vld [vmem:[%s4573_s4 + $0x30] sm:$0xff] }
 0x943   :  { %v1225_v58 = vmax.f32 %v1219_v53, 0.0  ;;  %v1214_v59 = vadd.f32 %v2808_v39, %v1213_v56  ;;  %v4045_v56 = vld [vmem:[%s4573_s4 + $0x20] sm:$0xff] }
 0x945   :  { %v1254_v61 = vrot.slane %v1225_v58, 7  ;;  %v1266_v63 = vrot.slane %v1225_v58, 1  ;;  %v1224_v1 = vmax.f32 %v1214_v59, 0.0  ;;  %1285 = vrot.lane.b32.xlu1 %v1225_v58, %s3384_s11 }
 0x947   :  { %v1253_v2 = vrot.slane %v1224_v1, 7  ;;  %v1265_v3 = vrot.slane %v1224_v1, 1  ;;  %1283 = vrot.lane.b32.xlu0 %v1224_v1, %s3384_s11  ;;  %v1258_v4 = vsel %vm1058_vm6, %v1254_v61, %v1251_v49  ;;  %v1270_v5 = vsel %vm1071_vm4, %v1266_v63, %v1263_v50 }
 0x948   :  { %v1259_v19 = vmul.f32 %v3837_v51, %v1258_v4  ;;  %v1274_v31 = vmul.f32 %v3827_v46, %v1270_v5 }
 0x949   :  { %v1268_v8 = vsel %vm1071_vm4, %v1264_v48, %v1265_v3  ;;  %v1267_v6 = vsel %vm1071_vm4, %v1265_v3, %v1266_v63  ;;  %v1256_v9 = vsel %vm1058_vm6, %v1252_v47, %v1253_v2  ;;  %v1255_v11 = vsel %vm1058_vm6, %v1253_v2, %v1254_v61 }
 0x94a   :  { %v1272_v12 = vmul.f32 %v3805_v27, %v1268_v8  ;;  %v1261_v29 = vmul.f32 %v3843_v60, %v1256_v9 }
 0x9af   :  { %v1282_v35 = vpop.permute.xlu1 %1281 }
 0x9b0   :  { %v1292_v13 = vsel %vm575_vm3, %v1257_v55, %v1282_v35  ;;  %v4036_v55 = vld [vmem:[%s4573_s4 + $0x28] sm:$0xff] }
 0x9b1   :  { %v1280_v21 = vpop.permute.xlu0 %1279 }
 0x9b2   :  { %v1291_v26 = vsel %vm575_vm3, %v1259_v19, %v1280_v21 }
 0x9b3   :  { %1376 = vmatmul.mubr.f32.vlgmr.msra.gmra.mxu1 %v1291_v26 }
 0x9b4   :  { %2815 = vmatprep.mubr.msk.f32.mxu1 %vm575_vm3, %v1272_v12 }
 0x9b7   :  { %1381 = vmatmul.mubr.f32.gmra.mxu1 %v1292_v13  ;;  %v1286_v32 = vpop.permute.xlu1 %1285 }
 0x9b8   :  { %2816 = vmatprep.mubr.msk.f32.mxu1 %vm575_vm3, %v1267_v6  ;;  %v1294_v16 = vsel %vm575_vm3, %v1255_v11, %v1286_v32 }
 0x9b9   :  { %v1284_v30 = vpop.permute.xlu0 %1283 }
 0x9ba   :  { %v1293_v15 = vsel %vm575_vm3, %v1261_v29, %v1284_v30 }
 0x9bb   :  { %1386 = vmatmul.mubr.f32.gmra.mxu1 %v1293_v15 }
 0x9bc   :  { %2817 = vmatprep.mubr.msk.f32.mxu1 %vm575_vm3, %v1274_v31 }
 0x9bf   :  { %1391 = vmatmul.mubr.f32.gmra.mxu1 %v1294_v16 }
 0xa73   :  { %v1377_v18 = vpop.f32.mrf.mxu1 }
 0xa74   :  { %v1378_v20 = vadd.f32 %v2813_v17, %v1377_v18 }
 0xa75   :  { %v1379_v22 = vpop.f32.mrf.mxu1 }
 0xa76   :  { %v3990_v23 = vadd.f32 %v1378_v20, %v3721_v0 }
 0xa77   :  { %v1382_v24 = vpop.f32.mrf.mxu1 }
 0xa78   :  { %v1383_v25 = vadd.f32 %v2813_v17, %v1382_v24  ;;  %v1402_v28 = vsel %vm218_vm1, %v3990_v23, 0.0  ;;  %v1414_v33 = vmul.f32 %v3990_v23, %v3990_v23 }
 0xa79   :  { %v1384_v34 = vpop.f32.mrf.mxu1  ;;  %1403 = vadd.xlane.f32.xlu0 %v1402_v28 }
 0xa7a   :  { %v3997_v37 = vadd.f32 %v1383_v25, %v3718_v62  ;;  %v1418_v0 = vsel %vm218_vm1, %v1414_v33, 0.0  ;;  %v2818_v25 = vld [vmem:[%s4574_s7 + $0x8] ss:$0 sm:$0xff]  ;;  %v2819_v33 = vld [vmem:[%s4574_s7 + $0x9] ss:$0 sm:$0xff] }
 0xa7b   :  { %v1387_v36 = vpop.f32.mrf.mxu1 }
 0xa7c   :  { %v1388_v40 = vadd.f32 %v2813_v17, %v1387_v36  ;;  %v1405_v39 = vsel %vm218_vm1, %v3997_v37, 0.0  ;;  %v1415_v41 = vmul.f32 %v3997_v37, %v3997_v37 }
 0xa7d   :  { %1406 = vadd.xlane.f32.xlu1 %v1405_v39  ;;  %1419 = vadd.xlane.f32.xlu0 %v1418_v0  ;;  %v1389_v38 = vpop.f32.mrf.mxu1 }
 0xa7e   :  { %v4005_v43 = vadd.f32 %v1388_v40, %v3731_v7  ;;  %v1421_v62 = vsel %vm218_vm1, %v1415_v41, 0.0 }
 0xa7f   :  { %v1392_v42 = vpop.f32.mrf.mxu1 }
 0xa80   :  { %v1393_v44 = vadd.f32 %v2813_v17, %v1392_v42  ;;  %v1408_v49 = vsel %vm218_vm1, %v4005_v43, 0.0  ;;  %v1416_v7 = vmul.f32 %v4005_v43, %v4005_v43 }
 0xa81   :  { %1422 = vadd.xlane.f32.xlu0 %v1421_v62  ;;  %v1394_v45 = vpop.f32.mrf.mxu1 }
 0xa82   :  { %v4009_v47 = vadd.f32 %v1393_v44, %v3733_v10  ;;  %v1424_v53 = vsel %vm218_vm1, %v1416_v7, 0.0  ;;  %v4024_v10 = vld [vmem:[%s4573_s4 + $0x38] sm:$0xff] }
 0xa83   :  { %3136 = vmatprep.subr.mxu0 %v4024_v10 }
 0xa84   :  { %v1411_v48 = vsel %vm218_vm1, %v4009_v47, 0.0  ;;  %v1417_v50 = vmul.f32 %v4009_v47, %v4009_v47  ;;  %3137 = vmatpush3.msra.mxu0 %v4024_v10 }
 0xa85   :  { %1412 = vadd.xlane.f32.xlu1 %v1411_v48  ;;  %1409 = vadd.xlane.f32.xlu0 %v1408_v49 }
 0xa86   :  { %v1427_v52 = vsel %vm218_vm1, %v1417_v50, 0.0  ;;  %3138 = vmatprep.subr.mxu0 %v4031_v54 }
 0xa87   :  { %3139 = vmatpush3.msra.mxu0 %v4031_v54 }
 0xa88   :  { %3140 = vmatprep.subr.mxu0 %v4036_v55 }
 0xa89   :  { %1428 = vadd.xlane.f32.xlu1 %v1427_v52  ;;  %1425 = vadd.xlane.f32.xlu0 %v1424_v53 }
 0xa8a   :  { %3141 = vmatpush3.msra.mxu0 %v4036_v55 }
 0xa8b   :  { %3142 = vmatprep.subr.mxu0 %v4045_v56 }
 0xa8c   :  { %3143 = vmatpush3.msra.mxu0 %v4045_v56 }
 0xb02   :  { %v1404_v58 = vpop.xlane.xlu0 %1403 }
 0xb03   :  { %v1430_v59 = vmul.f32 0.03125, %v1404_v58 }
 0xb05   :  { %v1438_v1 = vmul.f32 %v1430_v59, %v1430_v59  ;;  %v1446_v22 = vsub.f32 %v3990_v23, %v1430_v59  ;;  %v2820_v59 = vld [vmem:[%s4574_s7 + $0xc] ss:$0 sm:$0xff] }
 0xb06   :  { %v1407_v61 = vpop.xlane.xlu1 %1406  ;;  %v1420_v63 = vpop.xlane.xlu0 %1419 }
 0xb07   :  { %v1431_v2 = vmul.f32 0.03125, %v1407_v61  ;;  %v1434_v3 = vmul.f32 0.03125, %v1420_v63 }
 0xb09   :  { %v1442_v4 = vsub.f32 %v1434_v3, %v1438_v1  ;;  %v1439_v8 = vmul.f32 %v1431_v2, %v1431_v2  ;;  %v1447_v34 = vsub.f32 %v3997_v37, %v1431_v2 }
 0xb0a   :  { %v1423_v5 = vpop.xlane.xlu0 %1422 }
 0xb0b   :  { %v1450_v6 = vadd.f32 1e-05, %v1442_v4  ;;  %v1435_v9 = vmul.f32 0.03125, %v1423_v5 }
 0xb0d   :  { %3318 = vrsqrt.f32 %v1450_v6  ;;  %v1443_v11 = vsub.f32 %v1435_v9, %v1439_v8 }
 0xb0e   :  { %v1413_v19 = vpop.xlane.xlu1 %1412  ;;  %v1410_v21 = vpop.xlane.xlu0 %1409 }
 0xb0f   :  { %v1451_v26 = vadd.f32 1e-05, %v1443_v11  ;;  %v1433_v12 = vmul.f32 0.03125, %v1413_v19  ;;  %v1432_v35 = vmul.f32 0.03125, %v1410_v21 }
 0xb11   :  { %3320 = vrsqrt.f32 %v1451_v26  ;;  %v1441_v30 = vmul.f32 %v1433_v12, %v1433_v12  ;;  %v1440_v15 = vmul.f32 %v1432_v35, %v1432_v35  ;;  %v1449_v42 = vsub.f32 %v4009_v47, %v1433_v12 }
 0xb12   :  { %v1429_v13 = vpop.xlane.xlu1 %1428  ;;  %v1426_v29 = vpop.xlane.xlu0 %1425  ;;  %v1448_v62 = vsub.f32 %v4005_v43, %v1432_v35 }
 0xb13   :  { %v1437_v31 = vmul.f32 0.03125, %v1429_v13  ;;  %v1436_v32 = vmul.f32 0.03125, %v1426_v29 }
 0xb15   :  { %v1445_v16 = vsub.f32 %v1437_v31, %v1441_v30  ;;  %v1444_v17 = vsub.f32 %v1436_v32, %v1440_v15  ;;  %v3374_v31 = vld [vmem:[%s4575_s1 + $0x8] sm:$0xff] }
 0xb17   :  { %v1453_v18 = vadd.f32 1e-05, %v1445_v16  ;;  %v1452_v20 = vadd.f32 1e-05, %v1444_v17  ;;  %v3375_v17 = vld [vmem:[%s4575_s1] sm:$0xff] }
 0xb19   :  { %3322 = vrsqrt.f32 %v1453_v18 }
 0xb1a   :  { %v3319_v24 = vpop.eup %3318  ;;  %3324 = vrsqrt.f32 %v1452_v20 }
 0xb1b   :  { %v1458_v28 = vmul.f32 %v3319_v24, %v1446_v22  ;;  %v3376_v24 = vld [vmem:[%s4575_s1 + $0x18] sm:$0xff] }
 0xb1d   :  { %v1466_v36 = vmul.f32 %v2818_v25, %v1458_v28 }
 0xb1e   :  { %v3321_v40 = vpop.eup %3320 }
 0xb1f   :  { %v1459_v39 = vmul.f32 %v3321_v40, %v1447_v34  ;;  %v1474_v0 = vadd.f32 %v2819_v33, %v1466_v36  ;;  %v3377_v36 = vld [vmem:[%s4575_s1 + $0x10] sm:$0xff] }
 0xb21   :  { %v1467_v41 = vmul.f32 %v2818_v25, %v1459_v39  ;;  %3144 = vmatprep.mubr.msk.f32.mxu0 %vm218_vm1, %v1474_v0  ;;  %v3378_v39 = vld [vmem:[%s4575_s1 + $0x28] sm:$0xff] }
 0xb23   :  { %v1475_v38 = vadd.f32 %v2819_v33, %v1467_v41 }
 0xb25   :  { %3145 = vmatmul.mubr.msk.f32.vlgmr.msra.gmra.mxu0 %vm218_vm1, %v1475_v38 }
 0xb26   :  { %v3323_v44 = vpop.eup %3322 }
 0xb27   :  { %v3325_v45 = vpop.eup %3324  ;;  %v1461_v48 = vmul.f32 %v3323_v44, %v1449_v42 }
 0xb28   :  { %v1460_v49 = vmul.f32 %v3325_v45, %v1448_v62  ;;  %v3379_v62 = vld [vmem:[%s4575_s1 + $0x20] sm:$0xff] }
 0xb29   :  { %v1469_v50 = vmul.f32 %v2818_v25, %v1461_v48  ;;  %v3380_v48 = vld [vmem:[%s4575_s1 + $0x38] sm:$0xff] }
 0xb2a   :  { %v1468_v7 = vmul.f32 %v2818_v25, %v1460_v49 }
 0xb2b   :  { %v1477_v52 = vadd.f32 %v2819_v33, %v1469_v50 }
 0xb2c   :  { %v1476_v53 = vadd.f32 %v2819_v33, %v1468_v7 }
 0xb2e   :  { %3147 = vmatprep.mubr.msk.f32.mxu0 %vm218_vm1, %v1476_v53  ;;  %v3381_v53 = vld [vmem:[%s4575_s1 + $0x30] sm:$0xff] }
 0xb2f   :  { %3148 = vmatmul.mubr.msk.f32.gmra.mxu0 %vm218_vm1, %v1477_v52 }
 0xbe5   :  { %v3146_v58 = vpop.f32.mrf.mxu0 }
 0xbe6   :  { %v4078_v5 = vadd.f32 %v3146_v58, %v2820_v59 }
 0xbe7   :  { %v1565_v61 = vpop.f32.mrf.mxu0 }
 0xbe8   :  { %v4066_v63 = vadd.f32 %v2820_v59, %v1565_v61 }
 0xbea   :  { %3166 = vmatprep.mubr.msk.f32.mxu0 %vm437_vm2, %v4066_v63 }
 0xbef   :  { %v3149_v1 = vpop.f32.mrf.mxu0 }
 0xbf0   :  { %v4070_v2 = vadd.f32 %v3149_v1, %v2820_v59 }
 0xbf1   :  { %v1575_v3 = vpop.f32.mrf.mxu0 }
 0xbf2   :  { %v4072_v4 = vadd.f32 %v2820_v59, %v1575_v3  ;;  %1594 = vrot.lane.b32.xlu0 %v4070_v2, %s3382_s3 }
 0xbf4   :  { %1592 = vrot.lane.b32.xlu1 %v4072_v4, %s3382_s3 }
 0xbf8   :  { %1588 = vrot.lane.b32.xlu1 %v4078_v5, %s3382_s3 }
 0xbfc   :  { %1586 = vrot.lane.b32.xlu1 %v4066_v63, %s3382_s3 }
 0xc64   :  { %v4084_v8 = vpop.permute.xlu0 %1594 }
 0xc65   :  { %1610 = vrot.lane.b32.xlu0 %v4084_v8, %s3383_s17 }
 0xc66   :  { %v4088_v6 = vpop.permute.xlu1 %1592 }
 0xc67   :  { %1608 = vrot.lane.b32.xlu1 %v4088_v6, %s3383_s17 }
 0xc69   :  { %1606 = vrot.lane.b32.xlu0 %v4070_v2, %s3383_s17 }
 0xc6a   :  { %v4094_v9 = vpop.permute.xlu1 %1588 }
 0xc6b   :  { %1604 = vrot.lane.b32.xlu1 %v4072_v4, %s3383_s17 }
 0xc6d   :  { %1602 = vrot.lane.b32.xlu0 %v4094_v9, %s3383_s17 }
 0xc6e   :  { %v4100_v11 = vpop.permute.xlu1 %1586 }
 0xc6f   :  { %1600 = vrot.lane.b32.xlu1 %v4100_v11, %s3383_s17 }
 0xc71   :  { %1598 = vrot.lane.b32.xlu0 %v4078_v5, %s3383_s17 }
 0xc73   :  { %1596 = vrot.lane.b32.xlu1 %v4066_v63, %s3383_s17 }
 0xcd7   :  { %v1611_v19 = vpop.permute.xlu0 %1610 }
 0xcd8   :  { %3150 = vmatprep.subr.msk.mxu0 %vm437_vm2, %v1611_v19 }
 0xcd9   :  { %3151 = vmatpush3.xpose.msk.msra.mxu0 %vm437_vm2, %v1611_v19  ;;  %v1609_v21 = vpop.permute.xlu1 %1608 }
 0xcda   :  { %3152 = vmatprep.subr.msk.mxu0 %vm437_vm2, %v1609_v21 }
 0xcdb   :  { %v1607_v26 = vpop.permute.xlu0 %1606 }
 0xcdd   :  { %3153 = vmatpush3.xpose.msk.msra.mxu0 %vm437_vm2, %v1609_v21  ;;  %v1605_v12 = vpop.permute.xlu1 %1604 }
 0xcde   :  { %3154 = vmatprep.subr.msk.mxu0 %vm437_vm2, %v1607_v26 }
 0xcdf   :  { %v1603_v35 = vpop.permute.xlu0 %1602 }
 0xce1   :  { %3155 = vmatpush3.xpose.msk.msra.mxu0 %vm437_vm2, %v1607_v26  ;;  %v1601_v13 = vpop.permute.xlu1 %1600 }
 0xce2   :  { %3156 = vmatprep.subr.msk.mxu0 %vm437_vm2, %v1605_v12 }
 0xce3   :  { %v1599_v29 = vpop.permute.xlu0 %1598 }
 0xce5   :  { %3157 = vmatpush3.xpose.msk.msra.mxu0 %vm437_vm2, %v1605_v12  ;;  %v1597_v30 = vpop.permute.xlu1 %1596 }
 0xce6   :  { %3158 = vmatprep.subr.msk.mxu0 %vm437_vm2, %v1603_v35 }
 0xce9   :  { %3159 = vmatpush3.xpose.msk.msra.mxu0 %vm437_vm2, %v1603_v35 }
 0xcea   :  { %3160 = vmatprep.subr.msk.mxu0 %vm437_vm2, %v1601_v13 }
 0xced   :  { %3161 = vmatpush3.xpose.msk.msra.mxu0 %vm437_vm2, %v1601_v13 }
 0xcee   :  { %3162 = vmatprep.subr.msk.mxu0 %vm437_vm2, %v1599_v29 }
 0xcf1   :  { %3163 = vmatpush3.xpose.msk.msra.mxu0 %vm437_vm2, %v1599_v29 }
 0xcf2   :  { %3164 = vmatprep.subr.msk.mxu0 %vm437_vm2, %v1597_v30 }
 0xcf5   :  { %3165 = vmatpush3.xpose.msk.msra.mxu0 %vm437_vm2, %v1597_v30 }
 0xcf6   :  { %2481 = vmatprep.subr.mxu0 %v3387_v14 }
 0xcf8   :  { %3167 = vmatmul.mubr.msk.f32.vlgmr.msra.gmra.mxu0 %vm437_vm2, %v4078_v5 }
 0xcf9   :  { %3169 = vmatprep.mubr.msk.f32.mxu0 %vm437_vm2, %v4100_v11 }
 0xcfc   :  { %3170 = vmatmul.mubr.msk.f32.gmra.mxu0 %vm437_vm2, %v4094_v9 }
 0xcfd   :  { %3172 = vmatprep.mubr.msk.f32.mxu0 %vm437_vm2, %v4072_v4 }
 0xd00   :  { %3173 = vmatmul.mubr.msk.f32.gmra.mxu0 %vm437_vm2, %v4070_v2 }
 0xd01   :  { %3175 = vmatprep.mubr.msk.f32.mxu0 %vm437_vm2, %v4088_v6 }
 0xd04   :  { %3176 = vmatmul.mubr.msk.f32.gmra.mxu0 %vm437_vm2, %v4084_v8 }
 0xdb8   :  { %v3168_v15 = vpop.f32.mrf.mxu0 }
 0xdb9   :  { %v1716_v32 = vadd.f32 %v3374_v31, %v3168_v15 }
 0xdba   :  { %v1710_v16 = vpop.f32.mrf.mxu0 }
 0xdbb   :  { %v1711_v18 = vadd.f32 %v3375_v17, %v1710_v16  ;;  %v1752_v20 = vsel %vm575_vm3, %v1716_v32, -inf }
 0xdbc   :  { %1753 = vmax.xlane.f32.xlu1 %v1752_v20  ;;  %v3171_v22 = vpop.f32.mrf.mxu0 }
 0xdbd   :  { %v1726_v25 = vadd.f32 %v3376_v24, %v3171_v22  ;;  %v1749_v28 = vsel %vm575_vm3, %v1711_v18, -inf }
 0xdbe   :  { %v1720_v33 = vpop.f32.mrf.mxu0  ;;  %1750 = vmax.xlane.f32.xlu0 %v1749_v28 }
 0xdbf   :  { %v1721_v40 = vadd.f32 %v3377_v36, %v1720_v33  ;;  %v1758_v41 = vsel %vm575_vm3, %v1726_v25, -inf }
 0xdc0   :  { %v3174_v34 = vpop.f32.mrf.mxu0 }
 0xdc1   :  { %v1736_v0 = vadd.f32 %v3378_v39, %v3174_v34  ;;  %v1755_v50 = vsel %vm575_vm3, %v1721_v40, -inf }
 0xdc2   :  { %v1730_v38 = vpop.f32.mrf.mxu0  ;;  %1759 = vmax.xlane.f32.xlu0 %v1758_v41 }
 0xdc3   :  { %v1764_v42 = vsel %vm575_vm3, %v1736_v0, -inf  ;;  %v1731_v45 = vadd.f32 %v3379_v62, %v1730_v38 }
 0xdc4   :  { %1765 = vmax.xlane.f32.xlu1 %v1764_v42  ;;  %v3177_v44 = vpop.f32.mrf.mxu0 }
 0xdc5   :  { %v1746_v49 = vadd.f32 %v3380_v48, %v3177_v44  ;;  %v1761_v59 = vsel %vm575_vm3, %v1731_v45, -inf }
 0xdc6   :  { %v1740_v7 = vpop.f32.mrf.mxu0  ;;  %1756 = vmax.xlane.f32.xlu0 %v1755_v50 }
 0xdc7   :  { %v1770_v52 = vsel %vm575_vm3, %v1746_v49, -inf  ;;  %v1741_v58 = vadd.f32 %v3381_v53, %v1740_v7 }
 0xdc8   :  { %1771 = vmax.xlane.f32.xlu1 %v1770_v52 }
 0xdc9   :  { %v1767_v61 = vsel %vm575_vm3, %v1741_v58, -inf }
 0xdca   :  { %1762 = vmax.xlane.f32.xlu0 %v1761_v59 }
 0xdce   :  { %1768 = vmax.xlane.f32.xlu0 %v1767_v61 }
 0xdd9   :  { %1849 = vrot.lane.b32.xlu1 %v4088_v6, %s3384_s11 }
 0xddd   :  { %1847 = vrot.lane.b32.xlu1 %v4070_v2, %s3384_s11 }
 0xde1   :  { %1845 = vrot.lane.b32.xlu1 %v4072_v4, %s3384_s11 }
 0xde4   :  { %1851 = vrot.lane.b32.xlu0 %v4084_v8, %s3384_s11 }
 0xde5   :  { %1841 = vrot.lane.b32.xlu1 %v4100_v11, %s3384_s11 }
 0xde8   :  { %1843 = vrot.lane.b32.xlu0 %v4094_v9, %s3384_s11 }
 0xe45   :  { %v1754_v1 = vpop.xlane.xlu1 %1753 }
 0xe46   :  { %v1774_v3 = vsub.f32 %v1716_v32, %v1754_v1 }
 0xe47   :  { %v1751_v19 = vpop.xlane.xlu0 %1750 }
 0xe48   :  { %v1783_v21 = vmul.f32 1.442695, %v1774_v3  ;;  %v1773_v6 = vsub.f32 %v1711_v18, %v1751_v19 }
 0xe4a   :  { %3326 = vpow2.f32 %v1783_v21  ;;  %v1781_v26 = vmul.f32 1.442695, %v1773_v6 }
 0xe4b   :  { %v1760_v2 = vpop.xlane.xlu0 %1759 }
 0xe4c   :  { %3328 = vpow2.f32 %v1781_v26  ;;  %v1776_v12 = vsub.f32 %v1726_v25, %v1760_v2 }
 0xe4d   :  { %v1766_v4 = vpop.xlane.xlu1 %1765 }
 0xe4e   :  { %v1787_v35 = vmul.f32 1.442695, %v1776_v12  ;;  %v1778_v13 = vsub.f32 %v1736_v0, %v1766_v4 }
 0xe4f   :  { %v1757_v8 = vpop.xlane.xlu0 %1756 }
 0xe50   :  { %3330 = vpow2.f32 %v1787_v35  ;;  %v1791_v29 = vmul.f32 1.442695, %v1778_v13  ;;  %v1775_v11 = vsub.f32 %v1721_v40, %v1757_v8 }
 0xe51   :  { %v1772_v30 = vpop.xlane.xlu1 %1771 }
 0xe52   :  { %3332 = vpow2.f32 %v1791_v29  ;;  %v1785_v9 = vmul.f32 1.442695, %v1775_v11  ;;  %v1780_v15 = vsub.f32 %v1746_v49, %v1772_v30 }
 0xe53   :  { %v1763_v31 = vpop.xlane.xlu0 %1762 }
 0xe54   :  { %3334 = vpow2.f32 %v1785_v9  ;;  %v1795_v32 = vmul.f32 1.442695, %v1780_v15  ;;  %v1777_v16 = vsub.f32 %v1731_v45, %v1763_v31 }
 0xe55   :  { %v1850_v17 = vpop.permute.xlu1 %1849 }
 0xe56   :  { %3336 = vpow2.f32 %v1795_v32  ;;  %v1789_v18 = vmul.f32 1.442695, %v1777_v16 }
 0xe57   :  { %v4183_v20 = vpop.eup %3326  ;;  %v1769_v22 = vpop.xlane.xlu0 %1768 }
 0xe58   :  { %3338 = vpow2.f32 %v1789_v18  ;;  %v1779_v24 = vsub.f32 %v1741_v58, %v1769_v22  ;;  %v1800_v25 = vsel %vm575_vm3, %v4183_v20, 0.0 }
 0xe59   :  { %v3329_v28 = vpop.eup %3328  ;;  %1801 = vadd.xlane.f32.xlu1 %v1800_v25  ;;  %v1848_v34 = vpop.permute.xlu1 %1847 }
 0xe5a   :  { %v1793_v33 = vmul.f32 1.442695, %v1779_v24  ;;  %v1797_v36 = vsel %vm575_vm3, %v3329_v28, 0.0 }
 0xe5b   :  { %1798 = vadd.xlane.f32.xlu0 %v1797_v36  ;;  %v1852_v40 = vpop.permute.xlu0 %1851 }
 0xe5c   :  { %3340 = vpow2.f32 %v1793_v33  ;;  %3178 = vmatprep.subr.mxu1 %v1852_v40 }
 0xe5d   :  { %v4188_v39 = vpop.eup %3330  ;;  %3179 = vmatpush3.msra.mxu1 %v1852_v40  ;;  %v1846_v38 = vpop.permute.xlu1 %1845 }
 0xe5e   :  { %3180 = vmatprep.subr.mxu1 %v1850_v17  ;;  %v1806_v0 = vsel %vm575_vm3, %v4188_v39, 0.0 }
 0xe5f   :  { %v4192_v41 = vpop.eup %3332  ;;  %1807 = vadd.xlane.f32.xlu1 %v1806_v0  ;;  %3181 = vmatpush3.msra.mxu1 %v1850_v17  ;;  %v1844_v48 = vpop.permute.xlu0 %1843 }
 0xe60   :  { %3182 = vmatprep.subr.mxu1 %v1848_v34  ;;  %v1812_v44 = vsel %vm575_vm3, %v4192_v41, 0.0 }
 0xe61   :  { %v3335_v42 = vpop.eup %3334  ;;  %3183 = vmatpush3.msra.mxu1 %v1848_v34  ;;  %v1842_v50 = vpop.permute.xlu1 %1841 }
 0xe62   :  { %3184 = vmatprep.subr.mxu1 %v1846_v38  ;;  %v1803_v62 = vsel %vm575_vm3, %v3335_v42, 0.0 }
 0xe63   :  { %v4197_v45 = vpop.eup %3336  ;;  %1813 = vadd.xlane.f32.xlu1 %v1812_v44  ;;  %1804 = vadd.xlane.f32.xlu0 %v1803_v62 }
 0xe64   :  { %3185 = vmatpush3.msra.mxu1 %v1846_v38  ;;  %v1818_v7 = vsel %vm575_vm3, %v4197_v45, 0.0 }
 0xe65   :  { %v3339_v49 = vpop.eup %3338  ;;  %3186 = vmatprep.subr.mxu1 %v1844_v48 }
 0xe66   :  { %3187 = vmatpush3.msra.mxu1 %v1844_v48  ;;  %v1809_v52 = vsel %vm575_vm3, %v3339_v49, 0.0  ;;  %v2853_v48 = vld [vmem:[%s4574_s7 + $0xd] ss:$0 sm:$0xff] }
 0xe67   :  { %3188 = vmatprep.subr.mxu1 %v1842_v50  ;;  %1819 = vadd.xlane.f32.xlu1 %v1818_v7 }
 0xe68   :  { %1810 = vadd.xlane.f32.xlu0 %v1809_v52  ;;  %3189 = vmatpush3.msra.mxu1 %v1842_v50 }
 0xe69   :  { %v3341_v53 = vpop.eup %3340 }
 0xe6a   :  { %v1815_v58 = vsel %vm575_vm3, %v3341_v53, 0.0 }
 0xe6c   :  { %1816 = vadd.xlane.f32.xlu0 %v1815_v58 }
 0xe78   :  { %1837 = vrot.lane.b32.xlu1 %v4066_v63, %s3384_s11 }
 0xe7c   :  { %2018 = vrot.lane.b32.xlu1 %v4031_v54, %s3385_s12 }
 0xe82   :  { %1839 = vrot.lane.b32.xlu0 %v4078_v5, %s3384_s11 }
 0xe86   :  { %2020 = vrot.lane.b32.xlu0 %v4024_v10, %s3385_s12 }
 0xe8a   :  { %2016 = vrot.lane.b32.xlu0 %v4036_v55, %s3385_s12 }
 0xe8e   :  { %2014 = vrot.lane.b32.xlu0 %v4045_v56, %s3385_s12 }
 0xee2   :  { %v1802_v61 = vpop.xlane.xlu1 %1801 }
 0xee4   :  { %v1799_v59 = vpop.xlane.xlu0 %1798 }
 0xee5   :  { %3342 = vrcp.f32 %v1799_v59 }
 0xee6   :  { %3344 = vrcp.f32 %v1802_v61 }
 0xee8   :  { %v1808_v1 = vpop.xlane.xlu1 %1807 }
 0xeec   :  { %v1805_v63 = vpop.xlane.xlu0 %1804  ;;  %v1814_v54 = vpop.xlane.xlu1 %1813 }
 0xeed   :  { %3346 = vrcp.f32 %v1805_v63 }
 0xeee   :  { %3348 = vrcp.f32 %v1808_v1 }
 0xef0   :  { %v1820_v10 = vpop.xlane.xlu1 %1819 }
 0xef1   :  { %v1811_v3 = vpop.xlane.xlu0 %1810 }
 0xef2   :  { %v3343_v5 = vpop.eup %3342  ;;  %3350 = vrcp.f32 %v1811_v3 }
 0xef3   :  { %v1829_v19 = vmul.f32 %v3343_v5, %v3329_v28  ;;  %3352 = vrcp.f32 %v1814_v54  ;;  %v3345_v55 = vpop.eup %3344 }
 0xef4   :  { %v1838_v26 = vpop.permute.xlu1 %1837  ;;  %v1830_v2 = vmul.f32 %v3345_v55, %v4183_v20 }
 0xef5   :  { %v1817_v21 = vpop.xlane.xlu0 %1816  ;;  %3194 = vmatprep.mubr.msk.f32.mxu1 %vm575_vm3, %v1829_v19 }
 0xef6   :  { %3354 = vrcp.f32 %v1817_v21 }
 0xef7   :  { %3356 = vrcp.f32 %v1820_v10 }
 0xef8   :  { %v2019_v16 = vpop.permute.xlu1 %2018 }
 0xef9   :  { %v1840_v56 = vpop.permute.xlu0 %1839 }
 0xefa   :  { %3190 = vmatprep.subr.mxu1 %v1840_v56  ;;  %v3347_v6 = vpop.eup %3346 }
 0xefb   :  { %3191 = vmatpush3.msra.mxu1 %v1840_v56  ;;  %v1831_v12 = vmul.f32 %v3347_v6, %v3335_v42  ;;  %v3349_v4 = vpop.eup %3348 }
 0xefc   :  { %3192 = vmatprep.subr.mxu1 %v1838_v26  ;;  %v1832_v13 = vmul.f32 %v3349_v4, %v4188_v39  ;;  %v2222_v4 = vld [vmem:[%s4576_s5 + $0xa0] sm:$0xff] }
 0xefd   :  { %3193 = vmatpush3.msra.mxu1 %v1838_v26  ;;  %v2021_v32 = vpop.permute.xlu0 %2020  ;;  %v2225_v26 = vld [vmem:[%s4576_s5 + $0xb8] sm:$0xff] }
 0xefe   :  { %3195 = vmatmul.mubr.msk.f32.vlgmr.msra.gmra.mxu1 %vm575_vm3, %v1830_v2  ;;  %3206 = vmatprep.subr.mxu1 %v2021_v32  ;;  %v2224_v2 = vld [vmem:[%s4576_s5 + $0xb0] sm:$0xff] }
 0xeff   :  { %v3351_v35 = vpop.eup %3350  ;;  %3197 = vmatprep.mubr.msk.f32.mxu1 %vm575_vm3, %v1831_v12  ;;  %3207 = vmatpush3.msra.mxu1 %v2021_v32  ;;  %v2223_v12 = vld [vmem:[%s4576_s5 + $0xa8] sm:$0xff] }
 0xf00   :  { %v1833_v8 = vmul.f32 %v3351_v35, %v3339_v49  ;;  %v3353_v29 = vpop.eup %3352  ;;  %3208 = vmatprep.subr.mxu1 %v2019_v16  ;;  %v2221_v35 = vld [vmem:[%s4576_s5 + $0x98] sm:$0xff] }
 0xf01   :  { %v1834_v30 = vmul.f32 %v3353_v29, %v4192_v41  ;;  %3209 = vmatpush3.msra.mxu1 %v2019_v16  ;;  %v2017_v17 = vpop.permute.xlu0 %2016 }
 0xf02   :  { %3198 = vmatmul.mubr.msk.f32.gmra.mxu1 %vm575_vm3, %v1832_v13  ;;  %3210 = vmatprep.subr.mxu1 %v2017_v17  ;;  %v2220_v13 = vld [vmem:[%s4576_s5 + $0x90] sm:$0xff] }
 0xf03   :  { %v3355_v11 = vpop.eup %3354  ;;  %3200 = vmatprep.mubr.msk.f32.mxu1 %vm575_vm3, %v1833_v8  ;;  %3211 = vmatpush3.msra.mxu1 %v2017_v17  ;;  %v2219_v8 = vld [vmem:[%s4576_s5 + $0x88] sm:$0xff] }
 0xf04   :  { %v1835_v9 = vmul.f32 %v3355_v11, %v3341_v53  ;;  %v3357_v15 = vpop.eup %3356 }
 0xf05   :  { %v1836_v31 = vmul.f32 %v3357_v15, %v4197_v45  ;;  %v2015_v18 = vpop.permute.xlu0 %2014 }
 0xf06   :  { %3201 = vmatmul.mubr.msk.f32.gmra.mxu1 %vm575_vm3, %v1834_v30  ;;  %3212 = vmatprep.subr.mxu1 %v2015_v18 }
 0xf07   :  { %3203 = vmatprep.mubr.msk.f32.mxu1 %vm575_vm3, %v1835_v9  ;;  %3213 = vmatpush3.msra.mxu1 %v2015_v18 }
 0xf08   :  { %3220 = vmatprep.subr.mxu1 %v2225_v26 }
 0xf0a   :  { %3204 = vmatmul.mubr.msk.f32.gmra.mxu1 %vm575_vm3, %v1836_v31 }
 0xfbe   :  { %v3196_v20 = vpop.f32.mrf.mxu1 }
 0xfc0   :  { %v1951_v22 = vpop.f32.mrf.mxu1 }
 0xfc2   :  { %v3199_v24 = vpop.f32.mrf.mxu1 }
 0xfc4   :  { %v1961_v25 = vpop.f32.mrf.mxu1 }
 0xfc5   :  { %1992 = vrot.lane.b32.xlu1 %v1961_v25, %s3386_s13 }
 0xfc6   :  { %v3202_v28 = vpop.f32.mrf.mxu1 }
 0xfc8   :  { %v1971_v33 = vpop.f32.mrf.mxu1 }
 0xfc9   :  { %1994 = vrot.lane.b32.xlu1 %v3199_v24, %s3386_s13 }
 0xfca   :  { %v3205_v34 = vpop.f32.mrf.mxu1 }
 0xfcc   :  { %v1981_v36 = vpop.f32.mrf.mxu1 }
 0xfcd   :  { %2004 = vrot.lane.b32.xlu1 %v3205_v34, %s3386_s13  ;;  %2002 = vrot.lane.b32.xlu0 %v1981_v36, %s3386_s13 }
0x1037   :  { %v1993_v40 = vpop.permute.xlu1 %1992 }
0x1038   :  { %v1998_v39 = vsel %vm437_vm2, %v1951_v22, %v1993_v40 }
0x1039   :  { %3214 = vmatprep.mubr.msk.f32.mxu1 %vm218_vm1, %v1998_v39 }
0x103b   :  { %v1995_v0 = vpop.permute.xlu1 %1994 }
0x103c   :  { %v1999_v41 = vsel %vm437_vm2, %v3196_v20, %v1995_v0 }
0x103d   :  { %3215 = vmatmul.mubr.msk.f32.vlgmr.msra.gmra.mxu1 %vm218_vm1, %v1999_v41 }
0x103e   :  { %3221 = vmatpush3.msra.mxu1 %v2225_v26 }
0x103f   :  { %v2005_v38 = vpop.permute.xlu1 %2004  ;;  %v2003_v42 = vpop.permute.xlu0 %2002  ;;  %3222 = vmatprep.subr.mxu1 %v2224_v2 }
0x1040   :  { %v2009_v44 = vsel %vm437_vm2, %v3202_v28, %v2005_v38  ;;  %v2008_v62 = vsel %vm437_vm2, %v1971_v33, %v2003_v42  ;;  %3223 = vmatpush3.msra.mxu1 %v2224_v2 }
0x1041   :  { %3217 = vmatprep.mubr.msk.f32.mxu1 %vm218_vm1, %v2008_v62  ;;  %3224 = vmatprep.subr.mxu1 %v2223_v12 }
0x1042   :  { %3218 = vmatmul.mubr.msk.f32.gmra.mxu1 %vm218_vm1, %v2009_v44 }
0x1043   :  { %3225 = vmatpush3.msra.mxu1 %v2223_v12 }
0x1044   :  { %3226 = vmatprep.subr.mxu1 %v2222_v4 }
0x1045   :  { %3227 = vmatpush3.msra.mxu1 %v2222_v4 }
0x1046   :  { %3228 = vmatprep.subr.mxu1 %v2221_v35 }
0x1047   :  { %3229 = vmatpush3.msra.mxu1 %v2221_v35 }
0x1048   :  { %3230 = vmatprep.subr.mxu1 %v2220_v13 }
0x1049   :  { %3231 = vmatpush3.msra.mxu1 %v2220_v13 }
0x104a   :  { %3232 = vmatprep.subr.mxu1 %v2219_v8 }
0x104b   :  { %3233 = vmatpush3.msra.mxu1 %v2219_v8 }
0x10fd   :  { %v3216_v45 = vpop.f32.mrf.mxu1 }
0x10fe   :  { %v2124_v49 = vadd.f32 %v3216_v45, %v3997_v37 }
0x10ff   :  { %v2104_v50 = vpop.f32.mrf.mxu1 }
0x1100   :  { %v4243_v7 = vadd.f32 %v2853_v48, %v2124_v49  ;;  %v2123_v52 = vadd.f32 %v2104_v50, %v3990_v23  ;;  %v2217_v50 = vld [vmem:[%s4576_s5 + $0x78] sm:$0xff] }
0x1102   :  { %v4246_v53 = vadd.f32 %v2853_v48, %v2123_v52  ;;  %v3219_v58 = vpop.f32.mrf.mxu1  ;;  %v2141_v59 = vsel %vm218_vm1, %v4243_v7, 0.0  ;;  %v2151_v54 = vmul.f32 %v4243_v7, %v4243_v7  ;;  %v2216_v52 = vld [vmem:[%s4576_s5 + $0x70] sm:$0xff] }
0x1103   :  { %2142 = vadd.xlane.f32.xlu0 %v2141_v59  ;;  %v2126_v1 = vadd.f32 %v3219_v58, %v4009_v47 }
0x1104   :  { %v2114_v61 = vpop.f32.mrf.mxu1  ;;  %v2138_v37 = vsel %vm218_vm1, %v4246_v53, 0.0  ;;  %v2150_v19 = vmul.f32 %v4246_v53, %v4246_v53 }
0x1105   :  { %v2125_v63 = vadd.f32 %v2114_v61, %v4005_v43  ;;  %v4258_v23 = vadd.f32 %v2853_v48, %v2126_v1  ;;  %v2157_v43 = vsel %vm218_vm1, %v2151_v54, 0.0  ;;  %v2854_v61 = vld [vmem:[%s4574_s7 + $0xa] ss:$0 sm:$0xff] }
0x1106   :  { %v2154_v10 = vsel %vm218_vm1, %v2150_v19, 0.0  ;;  %v2215_v1 = vld [vmem:[%s4576_s5 + $0x68] sm:$0xff] }
0x1107   :  { %v4256_v3 = vadd.f32 %v2853_v48, %v2125_v63  ;;  %2139 = vadd.xlane.f32.xlu0 %v2138_v37  ;;  %v2153_v21 = vmul.f32 %v4258_v23, %v4258_v23  ;;  %v2147_v6 = vsel %vm218_vm1, %v4258_v23, 0.0  ;;  %v2218_v48 = vld [vmem:[%s4576_s5 + $0x80] sm:$0xff] }
0x1108   :  { %3234 = vmatprep.subr.mxu1 %v2218_v48  ;;  %v2214_v37 = vld [vmem:[%s4576_s5 + $0x60] sm:$0xff] }
0x1109   :  { %v2144_v5 = vsel %vm218_vm1, %v4256_v3, 0.0  ;;  %v2152_v47 = vmul.f32 %v4256_v3, %v4256_v3  ;;  %v2163_v56 = vsel %vm218_vm1, %v2153_v21, 0.0  ;;  %3235 = vmatpush3.msra.mxu1 %v2218_v48 }
0x110a   :  { %2145 = vadd.xlane.f32.xlu1 %v2144_v5  ;;  %3236 = vmatprep.subr.mxu1 %v2217_v50  ;;  %v2855_v5 = vld [vmem:[%s4574_s7 + $0xb] ss:$0 sm:$0xff] }
0x110b   :  { %2158 = vadd.xlane.f32.xlu0 %v2157_v43  ;;  %v2160_v55 = vsel %vm218_vm1, %v2152_v47, 0.0  ;;  %3237 = vmatpush3.msra.mxu1 %v2217_v50 }
0x110c   :  { %3238 = vmatprep.subr.mxu1 %v2216_v52 }
0x110d   :  { %3239 = vmatpush3.msra.mxu1 %v2216_v52 }
0x110e   :  { %2155 = vadd.xlane.f32.xlu1 %v2154_v10  ;;  %3240 = vmatprep.subr.mxu1 %v2215_v1 }
0x110f   :  { %2161 = vadd.xlane.f32.xlu0 %v2160_v55  ;;  %3241 = vmatpush3.msra.mxu1 %v2215_v1 }
0x1110   :  { %3242 = vmatprep.subr.mxu1 %v2214_v37 }
0x1111   :  { %3243 = vmatpush3.msra.mxu1 %v2214_v37 }
0x1112   :  { %2164 = vadd.xlane.f32.xlu1 %v2163_v56 }
0x1113   :  { %2148 = vadd.xlane.f32.xlu0 %v2147_v6 }
0x118c   :  { %v2143_v29 = vpop.xlane.xlu0 %2142 }
0x118d   :  { %v2167_v30 = vmul.f32 0.03125, %v2143_v29 }
0x118f   :  { %v2175_v32 = vmul.f32 %v2167_v30, %v2167_v30  ;;  %v2183_v58 = vsub.f32 %v4243_v7, %v2167_v30 }
0x1190   :  { %v2140_v11 = vpop.xlane.xlu0 %2139 }
0x1191   :  { %v2166_v15 = vmul.f32 0.03125, %v2140_v11 }
0x1193   :  { %v2146_v9 = vpop.xlane.xlu1 %2145  ;;  %v2174_v22 = vmul.f32 %v2166_v15, %v2166_v15  ;;  %v2182_v54 = vsub.f32 %v4246_v53, %v2166_v15 }
0x1194   :  { %v2159_v31 = vpop.xlane.xlu0 %2158  ;;  %v2168_v16 = vmul.f32 0.03125, %v2146_v9 }
0x1195   :  { %v2171_v17 = vmul.f32 0.03125, %v2159_v31 }
0x1196   :  { %v2176_v28 = vmul.f32 %v2168_v16, %v2168_v16  ;;  %v2184_v43 = vsub.f32 %v4256_v3, %v2168_v16 }
0x1197   :  { %v2179_v18 = vsub.f32 %v2171_v17, %v2175_v32  ;;  %v2156_v20 = vpop.xlane.xlu1 %2155 }
0x1198   :  { %v2170_v24 = vmul.f32 0.03125, %v2156_v20  ;;  %v2162_v25 = vpop.xlane.xlu0 %2161 }
0x1199   :  { %v2187_v33 = vadd.f32 1e-05, %v2179_v18  ;;  %v2172_v34 = vmul.f32 0.03125, %v2162_v25 }
0x119a   :  { %v2178_v36 = vsub.f32 %v2170_v24, %v2174_v22 }
0x119b   :  { %3358 = vrsqrt.f32 %v2187_v33  ;;  %v2180_v40 = vsub.f32 %v2172_v34, %v2176_v28  ;;  %v2165_v0 = vpop.xlane.xlu1 %2164 }
0x119c   :  { %v2186_v39 = vadd.f32 1e-05, %v2178_v36  ;;  %v2149_v41 = vpop.xlane.xlu0 %2148  ;;  %v2173_v44 = vmul.f32 0.03125, %v2165_v0 }
0x119d   :  { %v2188_v38 = vadd.f32 1e-05, %v2180_v40  ;;  %v2169_v42 = vmul.f32 0.03125, %v2149_v41 }
0x119e   :  { %3360 = vrsqrt.f32 %v2186_v39 }
0x119f   :  { %3362 = vrsqrt.f32 %v2188_v38  ;;  %v2177_v62 = vmul.f32 %v2169_v42, %v2169_v42  ;;  %v2185_v12 = vsub.f32 %v4258_v23, %v2169_v42 }
0x11a1   :  { %v2181_v45 = vsub.f32 %v2173_v44, %v2177_v62 }
0x11a3   :  { %v2189_v49 = vadd.f32 1e-05, %v2181_v45 }
0x11a5   :  { %3364 = vrsqrt.f32 %v2189_v49 }
0x11a8   :  { %v3359_v59 = vpop.eup %3358 }
0x11a9   :  { %v2195_v63 = vmul.f32 %v3359_v59, %v2183_v58 }
0x11ab   :  { %v3361_v19 = vpop.eup %3360  ;;  %v2203_v47 = vmul.f32 %v2854_v61, %v2195_v63 }
0x11ac   :  { %v3363_v10 = vpop.eup %3362  ;;  %v2194_v21 = vmul.f32 %v3361_v19, %v2182_v54  ;;  %v2411_v54 = vld [vmem:[%s4577_s6 + $0x138] sm:$0xff]  ;;  %v2409_v19 = vld [vmem:[%s4577_s6 + $0x128] sm:$0xff] }
0x11ad   :  { %v2211_v55 = vadd.f32 %v2855_v5, %v2203_v47  ;;  %v2196_v56 = vmul.f32 %v3363_v10, %v2184_v43  ;;  %2482 = vmatpush1.msra.mxu0 %v2411_v54  ;;  %v2408_v43 = vld [vmem:[%s4577_s6 + $0x120] sm:$0xff]  ;;  %v2407_v47 = vld [vmem:[%s4577_s6 + $0x118] sm:$0xff]  ;;  %v2406_v10 = vld [vmem:[%s4577_s6 + $0x110] sm:$0xff] }
0x11ae   :  { %v2202_v6 = vmul.f32 %v2854_v61, %v2194_v21  ;;  %2483 = vmatprep.subr.mxu0 %v3387_v14  ;;  %v2405_v21 = vld [vmem:[%s4577_s6 + $0x108] sm:$0xff] }
0x11af   :  { %2257 = vrot.lane.b32.xlu1 %v2211_v55, %s3385_s12  ;;  %v2204_v26 = vmul.f32 %v2854_v61, %v2196_v56  ;;  %v2240_v8 = vrot.slane %v2211_v55, 1  ;;  %v2228_v11 = vrot.slane %v2211_v55, 7  ;;  %v2404_v55 = vld [vmem:[%s4577_s6 + $0x100] sm:$0xff]  ;;  %v2403_v56 = vld [vmem:[%s4577_s6 + $0xf8] sm:$0xff] }
0x11b0   :  { %v2210_v2 = vadd.f32 %v2855_v5, %v2202_v6  ;;  %v2402_v6 = vld [vmem:[%s4577_s6 + $0xf0] sm:$0xff] }
0x11b1   :  { %v2212_v4 = vadd.f32 %v2855_v5, %v2204_v26  ;;  %v2401_v26 = vld [vmem:[%s4577_s6 + $0xe8] sm:$0xff] }
0x11b2   :  { %v3365_v35 = vpop.eup %3364  ;;  %2255 = vrot.lane.b32.xlu0 %v2210_v2, %s3385_s12  ;;  %v2239_v13 = vrot.slane %v2210_v2, 1  ;;  %v2227_v29 = vrot.slane %v2210_v2, 7  ;;  %v2400_v2 = vld [vmem:[%s4577_s6 + $0xe0] sm:$0xff] }
0x11b3   :  { %v2197_v30 = vmul.f32 %v3365_v35, %v2185_v12  ;;  %v2241_v9 = vrot.slane %v2212_v4, 1  ;;  %v2229_v15 = vrot.slane %v2212_v4, 7  ;;  %v2399_v12 = vld [vmem:[%s4577_s6 + $0xd8] sm:$0xff]  ;;  %v2397_v35 = vld [vmem:[%s4577_s6 + $0xc8] sm:$0xff] }
0x11b4   :  { %v2245_v31 = vsel %vm1071_vm4, %v2239_v13, %v2240_v8  ;;  %v2233_v32 = vsel %vm1058_vm6, %v2227_v29, %v2228_v11 }
0x11b5   :  { %v2205_v16 = vmul.f32 %v2854_v61, %v2197_v30  ;;  %2271 = vrot.lane.b32.xlu1 %v2245_v31, %s3384_s11  ;;  %v2244_v17 = vsel %vm1071_vm4, %v2240_v8, %v2241_v9  ;;  %v2232_v18 = vsel %vm1058_vm6, %v2228_v11, %v2229_v15  ;;  %v2419_v8 = vld [vmem:[%s4577_s6 + $0x178] sm:$0xff]  ;;  %v2417_v11 = vld [vmem:[%s4577_s6 + $0x168] sm:$0xff]  ;;  %v2416_v30 = vld [vmem:[%s4577_s6 + $0x160] sm:$0xff] }
0x11b6   :  { %2259 = vrot.lane.b32.xlu0 %v2212_v4, %s3385_s12  ;;  %v2248_v20 = vmul.f32 %v3805_v27, %v2244_v17  ;;  %v2237_v49 = vmul.f32 %v3843_v60, %v2232_v18  ;;  %v2398_v4 = vld [vmem:[%s4577_s6 + $0xd0] sm:$0xff]  ;;  %v2413_v31 = vld [vmem:[%s4577_s6 + $0x148] sm:$0xff] }
0x11b7   :  { %v2213_v22 = vadd.f32 %v2855_v5, %v2205_v16  ;;  %v2410_v5 = vld [vmem:[%s4577_s6 + $0x130] sm:$0xff]  ;;  %v2856_v16 = vld [vmem:[%s4574_s7 + $0xe] ss:$0 sm:$0xff] }
0x11b8   :  { %2484 = vmatpush1.msra.mxu0 %v2410_v5 }
0x11b9   :  { %2273 = vrot.lane.b32.xlu1 %v2248_v20, %s3384_s11  ;;  %v2242_v24 = vrot.slane %v2213_v22, 1  ;;  %v2230_v25 = vrot.slane %v2213_v22, 7  ;;  %2485 = vmatprep.subr.mxu0 %v3387_v14 }
0x11ba   :  { %2486 = vmatpush1.msra.mxu0 %v2409_v19 }
0x11bb   :  { %v2243_v28 = vsel %vm1071_vm4, %v2241_v9, %v2242_v24  ;;  %v2234_v33 = vsel %vm1058_vm6, %v2230_v25, %v2227_v29  ;;  %v2231_v34 = vsel %vm1058_vm6, %v2229_v15, %v2230_v25  ;;  %v2246_v36 = vsel %vm1071_vm4, %v2242_v24, %v2239_v13  ;;  %2487 = vmatprep.subr.mxu0 %v3387_v14  ;;  %v2396_v13 = vld [vmem:[%s4577_s6 + $0xc0] sm:$0xff]  ;;  %v2418_v29 = vld [vmem:[%s4577_s6 + $0x170] sm:$0xff]  ;;  %v2415_v9 = vld [vmem:[%s4577_s6 + $0x158] sm:$0xff] }
0x11bc   :  { %2275 = vrot.lane.b32.xlu0 %v2243_v28, %s3384_s11  ;;  %v2250_v40 = vmul.f32 %v3827_v46, %v2246_v36  ;;  %v2235_v41 = vmul.f32 %v3837_v51, %v2234_v33  ;;  %2488 = vmatpush1.msra.mxu0 %v2408_v43  ;;  %v2414_v15 = vld [vmem:[%s4577_s6 + $0x150] sm:$0xff] }
0x11bd   :  { %2261 = vrot.lane.b32.xlu1 %v2213_v22, %s3385_s12  ;;  %2489 = vmatprep.subr.mxu0 %v3387_v14 }
0x11be   :  { %2490 = vmatpush1.msra.mxu0 %v2407_v47 }
0x11bf   :  { %2491 = vmatprep.subr.mxu0 %v3387_v14 }
0x11c0   :  { %2492 = vmatpush1.msra.mxu0 %v2406_v10 }
0x11c1   :  { %2277 = vrot.lane.b32.xlu1 %v2250_v40, %s3384_s11  ;;  %2493 = vmatprep.subr.mxu0 %v3387_v14 }
0x11c2   :  { %2494 = vmatpush1.msra.mxu0 %v2405_v21 }
0x11c3   :  { %2495 = vmatprep.subr.mxu0 %v3387_v14 }
0x11c4   :  { %2496 = vmatpush1.msra.mxu0 %v2404_v55  ;;  %v2861_v55 = vld [vmem:[%s4574_s7 + $0xf] ss:$0 sm:$0xff] }
0x11c5   :  { %2497 = vmatprep.subr.mxu0 %v3387_v14 }
0x11c6   :  { %2498 = vmatpush1.msra.mxu0 %v2403_v56 }
0x11c7   :  { %2499 = vmatprep.subr.mxu0 %v3387_v14 }
0x11c8   :  { %2500 = vmatpush1.msra.mxu0 %v2402_v6 }
0x11c9   :  { %2501 = vmatprep.subr.mxu0 %v3387_v14 }
0x11ca   :  { %2502 = vmatpush1.msra.mxu0 %v2401_v26 }
0x11cb   :  { %2503 = vmatprep.subr.mxu0 %v3387_v14 }
0x11cc   :  { %2504 = vmatpush1.msra.mxu0 %v2400_v2 }
0x11cd   :  { %2505 = vmatprep.subr.mxu0 %v3387_v14 }
0x11ce   :  { %2506 = vmatpush1.msra.mxu0 %v2399_v12 }
0x11cf   :  { %2507 = vmatprep.subr.mxu0 %v3387_v14 }
0x11d0   :  { %2508 = vmatpush1.msra.mxu0 %v2398_v4 }
0x11d1   :  { %2509 = vmatprep.subr.mxu0 %v3387_v14 }
0x11d2   :  { %2510 = vmatpush1.msra.mxu0 %v2397_v35 }
0x11d3   :  { %2511 = vmatprep.subr.mxu0 %v3387_v14 }
0x11d4   :  { %2512 = vmatpush1.msra.mxu0 %v2396_v13 }
0x11d5   :  { %2529 = vmatprep.subr.mxu0 %v3387_v14 }
0x11d6   :  { %2530 = vmatpush2.msra.mxu0 %v2419_v8 }
0x11d7   :  { %2531 = vmatprep.subr.mxu0 %v3387_v14 }
0x11d8   :  { %2532 = vmatpush2.msra.mxu0 %v2418_v29 }
0x11d9   :  { %2533 = vmatprep.subr.mxu0 %v3387_v14 }
0x11da   :  { %2534 = vmatpush2.msra.mxu0 %v2417_v11 }
0x11db   :  { %2535 = vmatprep.subr.mxu0 %v3387_v14 }
0x11dc   :  { %2536 = vmatpush2.msra.mxu0 %v2416_v30 }
0x11dd   :  { %2537 = vmatprep.subr.mxu0 %v3387_v14 }
0x11de   :  { %2538 = vmatpush2.msra.mxu0 %v2415_v9 }
0x11df   :  { %2539 = vmatprep.subr.mxu0 %v3387_v14 }
0x11e0   :  { %2540 = vmatpush2.msra.mxu0 %v2414_v15 }
0x11e1   :  { %2541 = vmatprep.subr.mxu0 %v3387_v14 }
0x11e2   :  { %2542 = vmatpush2.msra.mxu0 %v2413_v31 }
0x11e3   :  { %2543 = vmatprep.subr.mxu0 %v3387_v14 }
0x1221   :  { %v2258_v39 = vpop.permute.xlu1 %2257 }
0x1222   :  { %v2284_v45 = vsel %vm218_vm1, %v2233_v32, %v2258_v39  ;;  %v2412_v32 = vld [vmem:[%s4577_s6 + $0x140] sm:$0xff] }
0x1223   :  { %2544 = vmatpush2.msra.mxu0 %v2412_v32 }
0x1224   :  { %v2256_v0 = vpop.permute.xlu0 %2255 }
0x1225   :  { %v2283_v38 = vsel %vm218_vm1, %v2235_v41, %v2256_v0 }
0x1227   :  { %v2272_v42 = vpop.permute.xlu1 %2271 }
0x1228   :  { %v2287_v44 = vsel %vm575_vm3, %v2283_v38, %v2272_v42  ;;  %v2260_v62 = vpop.permute.xlu0 %2259 }
0x1229   :  { %3244 = vmatprep.mubr.msk.f32.mxu1 %vm1124_vm10, %v2287_v44  ;;  %v2285_v52 = vsel %vm218_vm1, %v2237_v49, %v2260_v62 }
0x122b   :  { %v2274_v48 = vpop.permute.xlu1 %2273 }
0x122c   :  { %v2288_v50 = vsel %vm575_vm3, %v2284_v45, %v2274_v48 }
0x122d   :  { %3245 = vmatmul.mubr.msk.f32.vlgmr.msra.gmra.mxu1 %vm1124_vm10, %v2288_v50 }
0x122e   :  { %v2276_v58 = vpop.permute.xlu0 %2275 }
0x122f   :  { %v2289_v59 = vsel %vm575_vm3, %v2285_v52, %v2276_v58  ;;  %v2262_v61 = vpop.permute.xlu1 %2261 }
0x1230   :  { %3247 = vmatprep.mubr.msk.f32.mxu1 %vm1124_vm10, %v2289_v59  ;;  %v2286_v1 = vsel %vm218_vm1, %v2231_v34, %v2262_v61 }
0x1233   :  { %v2278_v63 = vpop.permute.xlu1 %2277 }
0x1234   :  { %v2290_v37 = vsel %vm575_vm3, %v2286_v1, %v2278_v63 }
0x1235   :  { %3248 = vmatmul.mubr.msk.f32.gmra.mxu1 %vm1124_vm10, %v2290_v37 }
0x12ed   :  { %v3246_v17 = vpop.f32.mrf.mxu1 }
0x12ee   :  { %v2379_v18 = vadd.f32 %v3246_v17, %v2856_v16 }
0x12ef   :  { %v2373_v20 = vpop.f32.mrf.mxu1 }
0x12f0   :  { %v2393_v22 = vmax.f32 %v2379_v18, 0.0  ;;  %v2374_v24 = vadd.f32 %v2856_v16, %v2373_v20 }
0x12f2   :  { %v2392_v25 = vmax.f32 %v2374_v24, 0.0  ;;  %2451 = vrot.lane.b32.xlu1 %v2393_v22, %s3384_s11  ;;  %v2422_v28 = vrot.slane %v2393_v22, 7  ;;  %v2434_v33 = vrot.slane %v2393_v22, 1 }
0x12f4   :  { %v2421_v14 = vrot.slane %v2392_v25, 7  ;;  %v2433_v34 = vrot.slane %v2392_v25, 1  ;;  %2449 = vrot.lane.b32.xlu0 %v2392_v25, %s3384_s11 }
0x12f5   :  { %v3249_v36 = vpop.f32.mrf.mxu1 }
0x12f6   :  { %v2389_v40 = vadd.f32 %v3249_v36, %v2856_v16  ;;  %v2439_v39 = vsel %vm1071_vm4, %v2433_v34, %v2434_v33  ;;  %v2427_v0 = vsel %vm1058_vm6, %v2421_v14, %v2422_v28 }
0x12f7   :  { %v2383_v41 = vpop.f32.mrf.mxu1  ;;  %2862 = vmatprep.mubr.msk.f32.mxu0 %vm575_vm3, %v2439_v39 }
0x12f8   :  { %v2395_v38 = vmax.f32 %v2389_v40, 0.0  ;;  %v2384_v42 = vadd.f32 %v2856_v16, %v2383_v41 }
0x12fa   :  { %v2424_v44 = vrot.slane %v2395_v38, 7  ;;  %v2436_v62 = vrot.slane %v2395_v38, 1  ;;  %v2394_v45 = vmax.f32 %v2384_v42, 0.0  ;;  %2455 = vrot.lane.b32.xlu1 %v2395_v38, %s3384_s11 }
0x12fc   :  { %v2423_v48 = vrot.slane %v2394_v45, 7  ;;  %v2435_v49 = vrot.slane %v2394_v45, 1  ;;  %2453 = vrot.lane.b32.xlu0 %v2394_v45, %s3384_s11  ;;  %v2428_v50 = vsel %vm1058_vm6, %v2424_v44, %v2421_v14  ;;  %v2440_v52 = vsel %vm1071_vm4, %v2436_v62, %v2433_v34  ;;  %v2648_v14 = vld [vmem:[%s4578_s8] sm:$0xff] }
0x12fd   :  { %v2429_v63 = vmul.f32 %v3837_v51, %v2428_v50  ;;  %v2444_v51 = vmul.f32 %v3827_v46, %v2440_v52 }
0x12fe   :  { %v2438_v58 = vsel %vm1071_vm4, %v2434_v33, %v2435_v49  ;;  %v2437_v59 = vsel %vm1071_vm4, %v2435_v49, %v2436_v62  ;;  %v2426_v61 = vsel %vm1058_vm6, %v2422_v28, %v2423_v48  ;;  %v2425_v1 = vsel %vm1058_vm6, %v2423_v48, %v2424_v44  ;;  %v2650_v28 = vld [vmem:[%s4578_s8 + $0x10] sm:$0xff]  ;;  %v2649_v33 = vld [vmem:[%s4578_s8 + $0x8] sm:$0xff] }
0x12ff   :  { %v2442_v5 = vmul.f32 %v3805_v27, %v2438_v58  ;;  %v2431_v47 = vmul.f32 %v3843_v60, %v2426_v61 }
0x1364   :  { %v2452_v19 = vpop.permute.xlu1 %2451 }
0x1365   :  { %v2462_v43 = vsel %vm575_vm3, %v2427_v0, %v2452_v19 }
0x1366   :  { %v2450_v37 = vpop.permute.xlu0 %2449 }
0x1367   :  { %v2461_v54 = vsel %vm575_vm3, %v2429_v63, %v2450_v37 }
0x1368   :  { %2546 = vmatmul.mubr.f32.vlgmr.msra.gmra.mxu0 %v2461_v54 }
0x1369   :  { %2863 = vmatprep.mubr.msk.f32.mxu0 %vm575_vm3, %v2442_v5 }
0x136c   :  { %2551 = vmatmul.mubr.f32.gmra.mxu0 %v2462_v43  ;;  %v2456_v21 = vpop.permute.xlu1 %2455 }
0x136d   :  { %2864 = vmatprep.mubr.msk.f32.mxu0 %vm575_vm3, %v2437_v59  ;;  %v2464_v27 = vsel %vm575_vm3, %v2425_v1, %v2456_v21 }
0x136e   :  { %v2454_v57 = vpop.permute.xlu0 %2453 }
0x136f   :  { %v2463_v10 = vsel %vm575_vm3, %v2431_v47, %v2454_v57 }
0x1370   :  { %2556 = vmatmul.mubr.f32.gmra.mxu0 %v2463_v10 }
0x1371   :  { %2865 = vmatprep.mubr.msk.f32.mxu0 %vm575_vm3, %v2444_v51 }
0x1374   :  { %2561 = vmatmul.mubr.f32.gmra.mxu0 %v2464_v27  ;;  %v2866_v27 = vld [vmem:[%s4574_s7 + $0x10] ss:$0 sm:$0xff] }
0x1428   :  { %v2547_v56 = vpop.f32.mrf.mxu0 }
0x1429   :  { %v2548_v6 = vadd.f32 %v2861_v55, %v2547_v56  ;;  %v2867_v56 = vld [vmem:[%s4574_s7 + $0x11] ss:$0 sm:$0xff] }
0x142a   :  { %v2549_v26 = vpop.f32.mrf.mxu0 }
0x142b   :  { %v4494_v60 = vadd.f32 %v2548_v6, %v4246_v53 }
0x142c   :  { %v2552_v2 = vpop.f32.mrf.mxu0 }
0x142d   :  { %v2553_v12 = vadd.f32 %v2861_v55, %v2552_v2  ;;  %v2572_v46 = vsel %vm218_vm1, %v4494_v60, 0.0  ;;  %v2584_v4 = vmul.f32 %v4494_v60, %v4494_v60 }
0x142e   :  { %v2554_v35 = vpop.f32.mrf.mxu0  ;;  %2573 = vadd.xlane.f32.xlu0 %v2572_v46 }
0x142f   :  { %v4501_v13 = vadd.f32 %v2553_v12, %v4243_v7  ;;  %v2588_v53 = vsel %vm218_vm1, %v2584_v4, 0.0 }
0x1430   :  { %v2557_v8 = vpop.f32.mrf.mxu0 }
0x1431   :  { %v2558_v29 = vadd.f32 %v2861_v55, %v2557_v8  ;;  %v2575_v11 = vsel %vm218_vm1, %v4501_v13, 0.0  ;;  %v2585_v30 = vmul.f32 %v4501_v13, %v4501_v13 }
0x1432   :  { %2576 = vadd.xlane.f32.xlu1 %v2575_v11  ;;  %2589 = vadd.xlane.f32.xlu0 %v2588_v53  ;;  %v2559_v9 = vpop.f32.mrf.mxu0 }
0x1433   :  { %v4509_v31 = vadd.f32 %v2558_v29, %v4256_v3  ;;  %v2591_v7 = vsel %vm218_vm1, %v2585_v30, 0.0 }
0x1434   :  { %v2562_v15 = vpop.f32.mrf.mxu0 }
0x1435   :  { %v2563_v32 = vadd.f32 %v2861_v55, %v2562_v15  ;;  %v2578_v20 = vsel %vm218_vm1, %v4509_v31, 0.0  ;;  %v2586_v3 = vmul.f32 %v4509_v31, %v4509_v31 }
0x1436   :  { %2592 = vadd.xlane.f32.xlu0 %v2591_v7  ;;  %v2564_v16 = vpop.f32.mrf.mxu0  ;;  %v2868_v7 = vld [vmem:[%s4574_s7 + $0x12] ss:$0 sm:$0xff] }
0x1437   :  { %v4513_v17 = vadd.f32 %v2563_v32, %v4258_v23  ;;  %v2594_v25 = vsel %vm218_vm1, %v2586_v3, 0.0  ;;  %v2651_v23 = vld [vmem:[%s4578_s8 + $0x18] sm:$0xff] }
0x1438   :  { %3250 = vmatprep.subr.mxu1 %v2651_v23 }
0x1439   :  { %v2581_v18 = vsel %vm218_vm1, %v4513_v17, 0.0  ;;  %v2587_v22 = vmul.f32 %v4513_v17, %v4513_v17  ;;  %3251 = vmatpush3.msra.mxu1 %v2651_v23 }
0x143a   :  { %2582 = vadd.xlane.f32.xlu1 %v2581_v18  ;;  %2579 = vadd.xlane.f32.xlu0 %v2578_v20 }
0x143b   :  { %v2597_v24 = vsel %vm218_vm1, %v2587_v22, 0.0  ;;  %3252 = vmatprep.subr.mxu1 %v2650_v28 }
0x143c   :  { %3253 = vmatpush3.msra.mxu1 %v2650_v28 }
0x143d   :  { %3254 = vmatprep.subr.mxu1 %v2649_v33 }
0x143e   :  { %2598 = vadd.xlane.f32.xlu1 %v2597_v24  ;;  %2595 = vadd.xlane.f32.xlu0 %v2594_v25 }
0x143f   :  { %3255 = vmatpush3.msra.mxu1 %v2649_v33 }
0x1440   :  { %3256 = vmatprep.subr.mxu1 %v2648_v14 }
0x1441   :  { %3257 = vmatpush3.msra.mxu1 %v2648_v14 }
0x14b7   :  { %v2574_v34 = vpop.xlane.xlu0 %2573 }
0x14b8   :  { %v2600_v36 = vmul.f32 0.03125, %v2574_v34 }
0x14ba   :  { %v2608_v0 = vmul.f32 %v2600_v36, %v2600_v36  ;;  %v2616_v51 = vsub.f32 %v4494_v60, %v2600_v36 }
0x14bb   :  { %v2577_v40 = vpop.xlane.xlu1 %2576  ;;  %v2590_v39 = vpop.xlane.xlu0 %2589 }
0x14bc   :  { %v2601_v41 = vmul.f32 0.03125, %v2577_v40  ;;  %v2604_v38 = vmul.f32 0.03125, %v2590_v39 }
0x14be   :  { %v2612_v42 = vsub.f32 %v2604_v38, %v2608_v0  ;;  %v2609_v62 = vmul.f32 %v2601_v41, %v2601_v41  ;;  %v2617_v6 = vsub.f32 %v4501_v13, %v2601_v41 }
0x14bf   :  { %v2593_v44 = vpop.xlane.xlu0 %2592 }
0x14c0   :  { %v2620_v45 = vadd.f32 1e-05, %v2612_v42  ;;  %v2605_v48 = vmul.f32 0.03125, %v2593_v44 }
0x14c2   :  { %3366 = vrsqrt.f32 %v2620_v45  ;;  %v2613_v49 = vsub.f32 %v2605_v48, %v2609_v62 }
0x14c3   :  { %v2583_v50 = vpop.xlane.xlu1 %2582  ;;  %v2580_v52 = vpop.xlane.xlu0 %2579 }
0x14c4   :  { %v2621_v58 = vadd.f32 1e-05, %v2613_v49  ;;  %v2603_v59 = vmul.f32 0.03125, %v2583_v50  ;;  %v2602_v61 = vmul.f32 0.03125, %v2580_v52 }
0x14c6   :  { %3368 = vrsqrt.f32 %v2621_v58  ;;  %v2611_v37 = vmul.f32 %v2603_v59, %v2603_v59  ;;  %v2610_v54 = vmul.f32 %v2602_v61, %v2602_v61  ;;  %v2619_v35 = vsub.f32 %v4513_v17, %v2603_v59 }
0x14c7   :  { %v2599_v1 = vpop.xlane.xlu1 %2598  ;;  %v2596_v63 = vpop.xlane.xlu0 %2595  ;;  %v2618_v29 = vsub.f32 %v4509_v31, %v2602_v61 }
0x14c8   :  { %v2607_v5 = vmul.f32 0.03125, %v2599_v1  ;;  %v2606_v19 = vmul.f32 0.03125, %v2596_v63 }
0x14ca   :  { %v2615_v43 = vsub.f32 %v2607_v5, %v2611_v37  ;;  %v2614_v47 = vsub.f32 %v2606_v19, %v2610_v54 }
0x14cc   :  { %v2623_v57 = vadd.f32 1e-05, %v2615_v43  ;;  %v2622_v10 = vadd.f32 1e-05, %v2614_v47 }
0x14ce   :  { %3370 = vrsqrt.f32 %v2623_v57 }
0x14cf   :  { %v3367_v21 = vpop.eup %3366  ;;  %3372 = vrsqrt.f32 %v2622_v10 }
0x14d0   :  { %v2628_v55 = vmul.f32 %v3367_v21, %v2616_v51 }
0x14d2   :  { %v2636_v26 = vmul.f32 %v2866_v27, %v2628_v55 }
0x14d3   :  { %v3369_v2 = vpop.eup %3368 }
0x14d4   :  { %v2629_v12 = vmul.f32 %v3369_v2, %v2617_v6  ;;  %v2644_v46 = vadd.f32 %v2867_v56, %v2636_v26 }
0x14d6   :  { %v2637_v4 = vmul.f32 %v2866_v27, %v2629_v12  ;;  %3258 = vmatprep.mubr.msk.f32.mxu1 %vm218_vm1, %v2644_v46 }
0x14d8   :  { %v2645_v60 = vadd.f32 %v2867_v56, %v2637_v4 }
0x14da   :  { %3259 = vmatmul.mubr.msk.f32.vlgmr.msra.gmra.mxu1 %vm218_vm1, %v2645_v60 }
0x14db   :  { %v3371_v8 = vpop.eup %3370 }
0x14dc   :  { %v3373_v11 = vpop.eup %3372  ;;  %v2631_v53 = vmul.f32 %v3371_v8, %v2619_v35 }
0x14dd   :  { %v2630_v30 = vmul.f32 %v3373_v11, %v2618_v29 }
0x14de   :  { %v2639_v9 = vmul.f32 %v2866_v27, %v2631_v53 }
0x14df   :  { %v2638_v13 = vmul.f32 %v2866_v27, %v2630_v30 }
0x14e0   :  { %v2647_v15 = vadd.f32 %v2867_v56, %v2639_v9 }
0x14e1   :  { %v2646_v32 = vadd.f32 %v2867_v56, %v2638_v13 }
0x14e3   :  { %3261 = vmatprep.mubr.msk.f32.mxu1 %vm218_vm1, %v2646_v32 }
0x14e4   :  { %3262 = vmatmul.mubr.msk.f32.gmra.mxu1 %vm218_vm1, %v2647_v15 }
0x159a   :  { %v3260_v16 = vpop.f32.mrf.mxu1 }
0x159b   :  { %v2741_v17 = vadd.f32 %v3260_v16, %v2868_v7 }
0x159c   :  { %v2735_v18 = vpop.f32.mrf.mxu1 }
0x159d   :  { %2755 = vst.msk [vmem:[%s4579_s9 + $0x8] sm:$0xff] %vm41_vm0, %v2741_v17  ;;  %v2736_v31 = vadd.f32 %v2868_v7, %v2735_v18 }
0x159f   :  { %2754 = vst.msk [vmem:[%s4579_s9] sm:$0xff] %vm41_vm0, %v2736_v31 }
0x15a4   :  { %v3263_v20 = vpop.f32.mrf.mxu1 }
0x15a5   :  { %v2751_v22 = vadd.f32 %v3263_v20, %v2868_v7 }
0x15a6   :  { %v2745_v3 = vpop.f32.mrf.mxu1 }
0x15a7   :  { %2757 = vst.msk [vmem:[%s4579_s9 + $0x18] sm:$0xff] %vm41_vm0, %v2751_v22  ;;  %v2746_v24 = vadd.f32 %v2868_v7, %v2745_v3 }
0x15a9   :  { %2756 = vst.msk [vmem:[%s4579_s9 + $0x10] sm:$0xff] %vm41_vm0, %v2746_v24 }

</bundles_post_ra>
